<compile_context>
chip_gen: v7x
topology: tpu7x:2x2x1
jax: 0.10.0
libtpu: 0.0.40
codegen_flags: <defaults>
</compile_context>

<pallas_src>
import functools

import jax
import jax.numpy as jnp
from jax.experimental import pallas as pl
from jax.experimental.pallas import tpu as pltpu


def _attention_block_kernel(x_ref, gmap_ref, gamma_ref, beta_ref,
                            wqkv_ref, bqkv_ref, wproj_ref, bproj_ref,
                            o_ref, *, eps):
    # Channels-first layout, one batch element per grid step.
    #   x_ref     (C, HW)     f32 activations
    #   gmap_ref  (C, C)      group-averaging matrix (1/cg inside same-group blocks)
    #   gamma/beta (C, 1)     GroupNorm affine
    #   wqkv_ref  (3C+1, C)   [Wq * C**-0.5 ; Wk ; Wv ; zeros]      (bf16)
    #   bqkv_ref  (3C+1, 1)   [bq * C**-0.5 ; bk ; bv ; 1.0]        (f32)
    #   wproj_ref (C, C)      proj weight (bf16);  bproj_ref (C, 1) (f32)
    #   o_ref     (C, HW)     f32 output (= x + proj(attn))
    x = x_ref[...]                                         # (C, HW) f32
    c = wproj_ref.shape[0]
    hw = x.shape[1]

    # ---- GroupNorm(32, C): per-channel stats -> one group-averaging matmul --
    s = jnp.sum(x, axis=1, keepdims=True)                  # (C, 1)  sum(x)
    sq = jnp.sum(x * x, axis=1, keepdims=True)             # (C, 1)  sum(x^2)
    stats = jnp.concatenate([s, sq], axis=1) * (1.0 / hw)  # (C, 2)  E[x], E[x^2]
    g = jnp.dot(gmap_ref[...], stats, preferred_element_type=jnp.float32)
    mean, ex2 = g[:, 0:1], g[:, 1:2]                       # (C, 1) group stats
    # One-pass variance; fine for normalised activations (two-pass if inputs
    # can carry large offsets).
    inv = jax.lax.rsqrt(ex2 - mean * mean + eps)           # (C, 1)
    gn_scale = inv * gamma_ref[...]
    gn_shift = beta_ref[...] - mean * gn_scale
    h = (x * gn_scale + gn_shift).astype(jnp.bfloat16)     # (C, HW)

    # ---- QKV projection (1x1 conv == channel matmul), bf16 MXU, f32 acc -----
    qkv = jnp.dot(wqkv_ref[...], h, preferred_element_type=jnp.float32)
    qkv = qkv + bqkv_ref[...]                              # (3C+1, HW)
    q = qkv[:c, :]                                         # (C, HW)  scale folded in
    k = qkv[c:2 * c, :]                                    # (C, HW)
    v1 = qkv[2 * c:, :].astype(jnp.bfloat16)               # (C+1, HW), last row == 1

    # ---- Attention over flattened spatial positions --------------------------
    # scores[i, j] = sum_c q[c, i] * k[c, j]; kept in f32 (per review) so the
    # internal lhs relayout and the softmax input stay accurate.
    scores = jax.lax.dot_general(
        q, k, (((0,), (0,)), ((), ())),
        preferred_element_type=jnp.float32)                # (HW, HW)
    m = jnp.max(scores, axis=-1, keepdims=True)
    p = jnp.exp(scores - m).astype(jnp.bfloat16)           # un-normalised weights

    # PV matmul; the appended ones-row of v makes it also emit the softmax row
    # sums, so normalisation is O(HW*C) after the matmul (EUP reciprocal + VPU
    # muls) instead of O(HW^2) before it.
    a1 = jax.lax.dot_general(
        v1, p, (((1,), (1,)), ((), ())),
        preferred_element_type=jnp.float32)                # (C+1, HW)
    inv_l = pl.reciprocal(a1[c:c + 1, :], approx=True)     # (1, HW) 1/row_sum
    a = (a1[:c, :] * inv_l).astype(jnp.bfloat16)           # (C, HW)

    # ---- Output projection + residual ----------------------------------------
    out = jnp.dot(wproj_ref[...], a, preferred_element_type=jnp.float32)
    out = out + bproj_ref[...]
    o_ref[...] = (x + out).astype(o_ref.dtype)


def _attention_pallas(x_flat, gmap, gamma, beta, wqkv, bqkv, wproj, bproj, *, eps):
    N, C, HW = x_flat.shape
    C3 = wqkv.shape[0]                                     # 3C + 1
    kernel = functools.partial(_attention_block_kernel, eps=eps)

    # Rough per-step VMEM footprint (monolithic attention).  Only raise the
    # scoped limit once the working set outgrows the most conservative default
    # (16 MiB on v5e / 32 MiB on v6e, v7x); at demo shapes nothing is set.
    # NOTE: v7x physical VMEM is 64 MiB/TC -- very large HW needs the
    # flash-tiled variant (see TODO at top), not a bigger limit.
    est = (2 * 2 * C * HW * 4                      # x / y blocks, double-buffered
           + (C3 * HW + (C + 1) * HW) * 4          # qkv f32, a1 f32
           + 2 * HW * HW * 4 + HW * HW * 2         # scores/exp f32 + p bf16
           + 3 * C * HW * 2                        # h, v1, a bf16
           + 2 * (C3 * C + C * C) * 2              # bf16 weights (double-buffered)
           + 2 * C * C * 4)                        # gmap f32 (double-buffered)
    compiler_kwargs = dict(dimension_semantics=("parallel",))
    if est > 14 * 1024 * 1024:
        compiler_kwargs["vmem_limit_bytes"] = min(
            int(est * 1.25) + (4 << 20), 120 * 1024 * 1024)

    return pl.pallas_call(
        kernel,
        out_shape=jax.ShapeDtypeStruct((N, C, HW), x_flat.dtype),
        grid_spec=pltpu.PrefetchScalarGridSpec(
            num_scalar_prefetch=0,
            grid=(N,),
            in_specs=[
                pl.BlockSpec((None, C, HW), lambda n: (n, 0, 0)),   # x
                pl.BlockSpec((C, C), lambda n: (0, 0)),             # gmap
                pl.BlockSpec((C, 1), lambda n: (0, 0)),             # gamma
                pl.BlockSpec((C, 1), lambda n: (0, 0)),             # beta
                pl.BlockSpec((C3, C), lambda n: (0, 0)),            # Wqkv (+ sum row)
                pl.BlockSpec((C3, 1), lambda n: (0, 0)),            # bqkv
                pl.BlockSpec((C, C), lambda n: (0, 0)),             # Wproj
                pl.BlockSpec((C, 1), lambda n: (0, 0)),             # bproj
            ],
            out_specs=pl.BlockSpec((None, C, HW), lambda n: (n, 0, 0)),
        ),
        compiler_params=pltpu.CompilerParams(**compiler_kwargs),
    )(x_flat, gmap, gamma, beta, wqkv, bqkv, wproj, bproj)


class AttentionBlock:
    """Pallas port of the PyTorch AttentionBlock(channels) module."""

    GROUPS = 32
    EPS = 1e-5

    def __init__(self, channels, key=None, dtype=jnp.float32):
        assert channels % self.GROUPS == 0, "GroupNorm(32, C) needs C % 32 == 0"
        self.channels = channels
        self.dtype = dtype
        C = channels
        if key is None:
            key = jax.random.PRNGKey(0)
        k_qw, k_qb, k_pw, k_pb, k_g, k_b = jax.random.split(key, 6)

        # --- parameters in PyTorch layouts (used by the pure-JAX reference) ---
        # nn.GroupNorm default init is gamma=1, beta=0; add small noise so the
        # affine path is exercised by the check.
        self.gamma = 1.0 + 0.02 * jax.random.normal(k_g, (C,), dtype)
        self.beta = 0.02 * jax.random.normal(k_b, (C,), dtype)
        # nn.Conv2d(C, 3C, 1): weight (3C, C, 1, 1), bias (3C,), U(+-1/sqrt(C))
        bound = 1.0 / (C ** 0.5)
        self.qkv_weight = jax.random.uniform(k_qw, (3 * C, C, 1, 1), dtype,
                                             minval=-bound, maxval=bound)
        self.qkv_bias = jax.random.uniform(k_qb, (3 * C,), dtype,
                                           minval=-bound, maxval=bound)
        # nn.Conv2d(C, C, 1)
        self.proj_weight = jax.random.uniform(k_pw, (C, C, 1, 1), dtype,
                                              minval=-bound, maxval=bound)
        self.proj_bias = jax.random.uniform(k_pb, (C,), dtype,
                                            minval=-bound, maxval=bound)

        # --- kernel-side parameters (channels-first; 1x1 conv == (Cout, Cin)) ---
        scale = float(C) ** -0.5
        w = self.qkv_weight[:, :, 0, 0]                      # (3C, C) [out, in]
        wq = w[:C] * scale                                   # softmax scale folded into Wq
        wk = w[C:2 * C]
        wv = w[2 * C:]
        # Extra "v channel": zero weights + bias 1 -> channel identically 1, so
        # the PV matmul also produces the softmax row sums.
        sum_row = jnp.zeros((1, C), dtype)
        self.wqkv = jnp.concatenate([wq, wk, wv, sum_row],
                                    axis=0).astype(jnp.bfloat16)          # (3C+1, C)
        bq = self.qkv_bias[:C] * scale
        bk = self.qkv_bias[C:2 * C]
        bv = self.qkv_bias[2 * C:]
        self.bqkv = jnp.concatenate([bq, bk, bv, jnp.ones((1,), dtype)]
                                    ).reshape(3 * C + 1, 1).astype(jnp.float32)
        self.wproj = self.proj_weight[:, :, 0, 0].astype(jnp.bfloat16)    # (C, C)
        self.bproj = self.proj_bias.reshape(C, 1).astype(jnp.float32)
        self.gamma_c = self.gamma.reshape(C, 1).astype(jnp.float32)
        self.beta_c = self.beta.reshape(C, 1).astype(jnp.float32)

        # Group-averaging matrix: (gmap @ per-channel stats) broadcasts each
        # group's mean back onto its channels; 1/cg inside same-group blocks.
        cg = C // self.GROUPS
        idx = jnp.arange(C)
        same_group = (idx[:, None] // cg) == (idx[None, :] // cg)
        self.gmap = jnp.where(same_group, 1.0 / cg, 0.0).astype(jnp.float32)

    def __call__(self, x_nchw):
        N, C, H, W = x_nchw.shape
        assert C == self.channels
        # Channels-first (N, C, HW): both reshapes are free (no data movement),
        # so the Pallas kernel is the only HBM reader/writer of the activation.
        x_flat = x_nchw.reshape(N, C, H * W)
        y_flat = _attention_pallas(
            x_flat, self.gmap, self.gamma_c, self.beta_c,
            self.wqkv, self.bqkv, self.wproj, self.bproj, eps=self.EPS)
        return y_flat.reshape(N, C, H, W)


def _reference_forward(block, x_nchw):
    """Pure-JAX f32 reference matching the PyTorch forward."""
    N, C, H, W = x_nchw.shape
    M = H * W
    G, cg = block.GROUPS, C // block.GROUPS
    xf = jnp.transpose(x_nchw, (0, 2, 3, 1)).reshape(N, M, C)
    xg = xf.reshape(N, M, G, cg)
    mean = xg.mean(axis=(1, 3), keepdims=True)
    var = ((xg - mean) ** 2).mean(axis=(1, 3), keepdims=True)
    h = ((xg - mean) / jnp.sqrt(var + block.EPS)).reshape(N, M, C)
    h = h * block.gamma + block.beta
    wqkv = jnp.transpose(block.qkv_weight[:, :, 0, 0], (1, 0))      # (C, 3C)
    qkv = jnp.einsum('nmc,cd->nmd', h, wqkv, precision="highest") + block.qkv_bias
    q, k, v = jnp.split(qkv, 3, axis=-1)
    w = jnp.einsum('nic,njc->nij', q, k, precision="highest") * (C ** -0.5)
    w = jax.nn.softmax(w, axis=-1)
    a = jnp.einsum('nij,njc->nic', w, v, precision="highest")
    wproj = jnp.transpose(block.proj_weight[:, :, 0, 0], (1, 0))
    out = jnp.einsum('nmc,cd->nmd', a, wproj, precision="highest") + block.proj_bias
    y = xf + out
    return jnp.transpose(y.reshape(N, H, W, C), (0, 3, 1, 2))


if __name__ == "__main__":
    key = jax.random.PRNGKey(0)
    kx, kp = jax.random.split(key)
    # GroupNorm(32, C) requires C % 32 == 0; smallest non-trivial choice with
    # >1 channel per group is C = 64.  Spatial 16x16 -> 256 attention positions.
    N, C, H, W = 2, 64, 16, 16
    x = jax.random.normal(kx, (N, C, H, W), jnp.float32)

    blk = AttentionBlock(C, key=kp)
    y = jax.block_until_ready(blk(x))
    assert y.shape == (N, C, H, W)

    y_ref = _reference_forward(blk, x)
    max_err = float(jnp.max(jnp.abs(y - y_ref)))
    # bf16 MXU operands on the QKV / PV / proj matmuls -> tolerance is looser
    # than a pure-f32 kernel (observed errors land in the low 1e-3 range).
    assert jnp.allclose(y, y_ref, atol=1e-2, rtol=1e-2), (
        f"attention block mismatch: max abs err = {max_err}")

    print("KERNEL_OK")
</pallas_src>

<mosaic_0001>
module attributes {stable_mosaic.version = 11 : i64} {
  func.func @_attention_block_kernel(%arg0: i32, %arg1: memref<1x64x256xf32, #tpu.memory_space<vmem>>, %arg2: memref<64x64xf32, #tpu.memory_space<vmem>>, %arg3: memref<64x1xf32, #tpu.memory_space<vmem>>, %arg4: memref<64x1xf32, #tpu.memory_space<vmem>>, %arg5: memref<193x64xbf16, #tpu.memory_space<vmem>>, %arg6: memref<193x1xf32, #tpu.memory_space<vmem>>, %arg7: memref<64x64xbf16, #tpu.memory_space<vmem>>, %arg8: memref<64x1xf32, #tpu.memory_space<vmem>>, %arg9: memref<1x64x256xf32, #tpu.memory_space<vmem>>) attributes {dimension_semantics = [#tpu.dimension_semantics<parallel>], iteration_bounds = array<i64: 2>, scalar_prefetch = 0 : i64, scratch_operands = 0 : i64, tpu.core_type = #tpu.core_type<tc>, window_params = [{transform_indices = @transform_0, window_bounds = array<i64: 1, 64, 256>}, {pipeline_mode = #tpu.pipeline_mode<synchronous>, transform_indices = @transform_1, window_bounds = array<i64: 64, 64>}, {pipeline_mode = #tpu.pipeline_mode<synchronous>, transform_indices = @transform_2, window_bounds = array<i64: 64, 1>}, {pipeline_mode = #tpu.pipeline_mode<synchronous>, transform_indices = @transform_3, window_bounds = array<i64: 64, 1>}, {pipeline_mode = #tpu.pipeline_mode<synchronous>, transform_indices = @transform_4, window_bounds = array<i64: 193, 64>}, {pipeline_mode = #tpu.pipeline_mode<synchronous>, transform_indices = @transform_5, window_bounds = array<i64: 193, 1>}, {pipeline_mode = #tpu.pipeline_mode<synchronous>, transform_indices = @transform_6, window_bounds = array<i64: 64, 64>}, {pipeline_mode = #tpu.pipeline_mode<synchronous>, transform_indices = @transform_7, window_bounds = array<i64: 64, 1>}, {transform_indices = @transform_8, window_bounds = array<i64: 1, 64, 256>}]} {
    %c0 = arith.constant 0 : index
    %c0_0 = arith.constant 0 : index
    %c0_1 = arith.constant 0 : index
    %0 = vector.load %arg1[%c0, %c0_0, %c0_1] : memref<1x64x256xf32, #tpu.memory_space<vmem>>, vector<1x64x256xf32>
    %1 = vector.shape_cast %0 : vector<1x64x256xf32> to vector<64x256xf32>
    %cst = arith.constant dense<0.000000e+00> : vector<64xf32>
    %2 = vector.multi_reduction <add>, %1, %cst [1] : vector<64x256xf32> to vector<64xf32>
    %3 = vector.shape_cast %2 : vector<64xf32> to vector<64x1xf32>
    %4 = arith.mulf %1, %1 : vector<64x256xf32>
    %cst_2 = arith.constant dense<0.000000e+00> : vector<64xf32>
    %5 = vector.multi_reduction <add>, %4, %cst_2 [1] : vector<64x256xf32> to vector<64xf32>
    %6 = vector.shape_cast %5 : vector<64xf32> to vector<64x1xf32>
    %7 = tpu.concatenate %3, %6 in 1 : vector<64x1xf32>, vector<64x1xf32> -> vector<64x2xf32>
    %cst_3 = arith.constant 3.906250e-03 : f32
    %8 = vector.broadcast %cst_3 : f32 to vector<64x2xf32>
    %9 = arith.mulf %7, %8 : vector<64x2xf32>
    %c0_4 = arith.constant 0 : index
    %c0_5 = arith.constant 0 : index
    %10 = vector.load %arg2[%c0_4, %c0_5] : memref<64x64xf32, #tpu.memory_space<vmem>>, vector<64x64xf32>
    %cst_6 = arith.constant dense<0.000000e+00> : vector<64x2xf32>
    %11 = tpu.matmul %10, %9, %cst_6 {dimension_numbers = #tpu.dot_dimension_numbers<[1], [0], [0], [1], [0, 0, 1, 1], [], []>} : vector<64x64xf32>, vector<64x2xf32>, vector<64x2xf32> -> vector<64x2xf32>
    %12 = vector.extract_strided_slice %11 {offsets = [0, 0], sizes = [64, 1], strides = [1, 1]} : vector<64x2xf32> to vector<64x1xf32>
    %13 = vector.extract_strided_slice %11 {offsets = [0, 1], sizes = [64, 1], strides = [1, 1]} : vector<64x2xf32> to vector<64x1xf32>
    %14 = arith.mulf %12, %12 : vector<64x1xf32>
    %15 = arith.subf %13, %14 : vector<64x1xf32>
    %cst_7 = arith.constant 9.99999974E-6 : f32
    %16 = vector.broadcast %cst_7 : f32 to vector<64x1xf32>
    %17 = arith.addf %15, %16 : vector<64x1xf32>
    %18 = math.rsqrt %17 : vector<64x1xf32>
    %c0_8 = arith.constant 0 : index
    %c0_9 = arith.constant 0 : index
    %19 = vector.load %arg3[%c0_8, %c0_9] : memref<64x1xf32, #tpu.memory_space<vmem>>, vector<64x1xf32>
    %20 = arith.mulf %18, %19 : vector<64x1xf32>
    %c0_10 = arith.constant 0 : index
    %c0_11 = arith.constant 0 : index
    %21 = vector.load %arg4[%c0_10, %c0_11] : memref<64x1xf32, #tpu.memory_space<vmem>>, vector<64x1xf32>
    %22 = arith.mulf %12, %20 : vector<64x1xf32>
    %23 = arith.subf %21, %22 : vector<64x1xf32>
    %24 = vector.broadcast %20 : vector<64x1xf32> to vector<64x256xf32>
    %25 = arith.mulf %1, %24 : vector<64x256xf32>
    %26 = vector.broadcast %23 : vector<64x1xf32> to vector<64x256xf32>
    %27 = arith.addf %25, %26 : vector<64x256xf32>
    %28 = arith.truncf %27 : vector<64x256xf32> to vector<64x256xbf16>
    %c0_12 = arith.constant 0 : index
    %c0_13 = arith.constant 0 : index
    %29 = vector.load %arg5[%c0_12, %c0_13] : memref<193x64xbf16, #tpu.memory_space<vmem>>, vector<193x64xbf16>
    %cst_14 = arith.constant dense<0.000000e+00> : vector<193x256xf32>
    %30 = tpu.matmul %29, %28, %cst_14 {dimension_numbers = #tpu.dot_dimension_numbers<[1], [0], [0], [1], [0, 0, 1, 1], [], []>} : vector<193x64xbf16>, vector<64x256xbf16>, vector<193x256xf32> -> vector<193x256xf32>
    %c0_15 = arith.constant 0 : index
    %c0_16 = arith.constant 0 : index
    %31 = vector.load %arg6[%c0_15, %c0_16] : memref<193x1xf32, #tpu.memory_space<vmem>>, vector<193x1xf32>
    %32 = vector.broadcast %31 : vector<193x1xf32> to vector<193x256xf32>
    %33 = arith.addf %30, %32 : vector<193x256xf32>
    %34 = vector.extract_strided_slice %33 {offsets = [0, 0], sizes = [64, 256], strides = [1, 1]} : vector<193x256xf32> to vector<64x256xf32>
    %35 = vector.extract_strided_slice %33 {offsets = [64, 0], sizes = [64, 256], strides = [1, 1]} : vector<193x256xf32> to vector<64x256xf32>
    %36 = vector.extract_strided_slice %33 {offsets = [128, 0], sizes = [65, 256], strides = [1, 1]} : vector<193x256xf32> to vector<65x256xf32>
    %37 = arith.truncf %36 : vector<65x256xf32> to vector<65x256xbf16>
    %cst_17 = arith.constant dense<0.000000e+00> : vector<256x256xf32>
    %38 = tpu.matmul %34, %35, %cst_17 {dimension_numbers = #tpu.dot_dimension_numbers<[0], [0], [1], [1], [0, 1, 1, 1], [], []>} : vector<64x256xf32>, vector<64x256xf32>, vector<256x256xf32> -> vector<256x256xf32>
    %cst_18 = arith.constant dense<0xFF800000> : vector<256xf32>
    %39 = vector.multi_reduction <maximumf>, %38, %cst_18 [1] : vector<256x256xf32> to vector<256xf32>
    %40 = vector.shape_cast %39 : vector<256xf32> to vector<256x1xf32>
    %41 = vector.broadcast %40 : vector<256x1xf32> to vector<256x256xf32>
    %42 = arith.subf %38, %41 : vector<256x256xf32>
    %43 = math.exp %42 : vector<256x256xf32>
    %44 = arith.truncf %43 : vector<256x256xf32> to vector<256x256xbf16>
    %cst_19 = arith.constant dense<0.000000e+00> : vector<65x256xf32>
    %45 = tpu.matmul %37, %44, %cst_19 {dimension_numbers = #tpu.dot_dimension_numbers<[1], [1], [0], [0], [0, 0, 1, 0], [], []>} : vector<65x256xbf16>, vector<256x256xbf16>, vector<65x256xf32> -> vector<65x256xf32>
    %46 = vector.extract_strided_slice %45 {offsets = [64, 0], sizes = [1, 256], strides = [1, 1]} : vector<65x256xf32> to vector<1x256xf32>
    %47 = tpu.reciprocal %46 {approx = true} : vector<1x256xf32> -> vector<1x256xf32>
    %48 = vector.extract_strided_slice %45 {offsets = [0, 0], sizes = [64, 256], strides = [1, 1]} : vector<65x256xf32> to vector<64x256xf32>
    %49 = vector.broadcast %47 : vector<1x256xf32> to vector<64x256xf32>
    %50 = arith.mulf %48, %49 : vector<64x256xf32>
    %51 = arith.truncf %50 : vector<64x256xf32> to vector<64x256xbf16>
    %c0_20 = arith.constant 0 : index
    %c0_21 = arith.constant 0 : index
    %52 = vector.load %arg7[%c0_20, %c0_21] : memref<64x64xbf16, #tpu.memory_space<vmem>>, vector<64x64xbf16>
    %cst_22 = arith.constant dense<0.000000e+00> : vector<64x256xf32>
    %53 = tpu.matmul %52, %51, %cst_22 {dimension_numbers = #tpu.dot_dimension_numbers<[1], [0], [0], [1], [0, 0, 1, 1], [], []>} : vector<64x64xbf16>, vector<64x256xbf16>, vector<64x256xf32> -> vector<64x256xf32>
    %c0_23 = arith.constant 0 : index
    %c0_24 = arith.constant 0 : index
    %54 = vector.load %arg8[%c0_23, %c0_24] : memref<64x1xf32, #tpu.memory_space<vmem>>, vector<64x1xf32>
    %55 = vector.broadcast %54 : vector<64x1xf32> to vector<64x256xf32>
    %56 = arith.addf %53, %55 : vector<64x256xf32>
    %57 = arith.addf %1, %56 : vector<64x256xf32>
    %c0_25 = arith.constant 0 : index
    %c0_26 = arith.constant 0 : index
    %c0_27 = arith.constant 0 : index
    %58 = vector.load %arg9[%c0_25, %c0_26, %c0_27] : memref<1x64x256xf32, #tpu.memory_space<vmem>>, vector<1x64x256xf32>
    %59 = vector.shape_cast %58 : vector<1x64x256xf32> to vector<64x256xf32>
    %60 = vector.shape_cast %57 : vector<64x256xf32> to vector<1x64x256xf32>
    tpu.vector_store %arg9[%c0_25, %c0_26, %c0_27], %60 {strides = array<i32>} : memref<1x64x256xf32, #tpu.memory_space<vmem>>, vector<1x64x256xf32>,
    return
  }
  func.func @transform_0(%arg0: i32) -> (i32, i32, i32) {
    %c0_i32 = arith.constant 0 : i32
    %c0_i32_0 = arith.constant 0 : i32
    %c0_i32_1 = arith.constant 0 : i32
    return %arg0, %c0_i32, %c0_i32_0 : i32, i32, i32
  }
  func.func @transform_1(%arg0: i32) -> (i32, i32) {
    %c0_i32 = arith.constant 0 : i32
    %c0_i32_0 = arith.constant 0 : i32
    %c0_i32_1 = arith.constant 0 : i32
    return %c0_i32, %c0_i32_0 : i32, i32
  }
  func.func @transform_2(%arg0: i32) -> (i32, i32) {
    %c0_i32 = arith.constant 0 : i32
    %c0_i32_0 = arith.constant 0 : i32
    %c0_i32_1 = arith.constant 0 : i32
    return %c0_i32, %c0_i32_0 : i32, i32
  }
  func.func @transform_3(%arg0: i32) -> (i32, i32) {
    %c0_i32 = arith.constant 0 : i32
    %c0_i32_0 = arith.constant 0 : i32
    %c0_i32_1 = arith.constant 0 : i32
    return %c0_i32, %c0_i32_0 : i32, i32
  }
  func.func @transform_4(%arg0: i32) -> (i32, i32) {
    %c0_i32 = arith.constant 0 : i32
    %c0_i32_0 = arith.constant 0 : i32
    %c0_i32_1 = arith.constant 0 : i32
    return %c0_i32, %c0_i32_0 : i32, i32
  }
  func.func @transform_5(%arg0: i32) -> (i32, i32) {
    %c0_i32 = arith.constant 0 : i32
    %c0_i32_0 = arith.constant 0 : i32
    %c0_i32_1 = arith.constant 0 : i32
    return %c0_i32, %c0_i32_0 : i32, i32
  }
  func.func @transform_6(%arg0: i32) -> (i32, i32) {
    %c0_i32 = arith.constant 0 : i32
    %c0_i32_0 = arith.constant 0 : i32
    %c0_i32_1 = arith.constant 0 : i32
    return %c0_i32, %c0_i32_0 : i32, i32
  }
  func.func @transform_7(%arg0: i32) -> (i32, i32) {
    %c0_i32 = arith.constant 0 : i32
    %c0_i32_0 = arith.constant 0 : i32
    %c0_i32_1 = arith.constant 0 : i32
    return %c0_i32, %c0_i32_0 : i32, i32
  }
  func.func @transform_8(%arg0: i32) -> (i32, i32, i32) {
    %c0_i32 = arith.constant 0 : i32
    %c0_i32_0 = arith.constant 0 : i32
    %c0_i32_1 = arith.constant 0 : i32
    return %arg0, %c0_i32, %c0_i32_0 : i32, i32, i32
  }
}

</mosaic_0001>

<bundles_post_ra>
// kernel: tpu_custom_call.1
= control target key start
LH: loop header
LB: loop body
LE: loop exit
PB: predicated region body
PF: predicated region fallthrough
CT: control target
= control target key end

     0   :  { %13 = vsyncpa [#allocation3], 0  ;;  %s3875_s0 = inlined_call_operand.vmem [shape: f32[2,64,256], index: 0, kind: input, shape index: {}]   ;;  %s3876_s1 = inlined_call_operand.vmem [shape: f32[64,64], index: 1, kind: input, shape index: {}]   ;;  %s3877_s2 = inlined_call_operand.vmem [shape: f32[64,1], index: 2, kind: input, shape index: {}]   ;;  %s3878_s3 = inlined_call_operand.vmem [shape: f32[64,1], index: 3, kind: input, shape index: {}]   ;;  %s3879_s4 = inlined_call_operand.vmem [shape: bf16[193,64], index: 4, kind: input, shape index: {}]   ;;  %s3880_s5 = inlined_call_operand.vmem [shape: f32[193,1], index: 5, kind: input, shape index: {}]   ;;  %s3881_s6 = inlined_call_operand.vmem [shape: bf16[64,64], index: 6, kind: input, shape index: {}]   ;;  %s3882_s7 = inlined_call_operand.vmem [shape: f32[64,1], index: 7, kind: input, shape index: {}]   ;;  %s3883_s8 = inlined_call_operand.hbm [shape: f32[2,64,256], index: 8, kind: output, shape index: {}]  }
   0x1   :  { %15 = vsyncpa [#allocation3 + $0x1], 0  ;;  %s2901_s27 = smov 0   ;;  %s2903_s28 = smov 0  }
   0x2   :  { %s2905_s29 = smov 0   ;;  %s2907_s30 = smov 0  }
   0x3 LB: > { %s2922_s9 = sadd.s32 4294967295, %s2846_s30   ;;  %s2389_s10 = sadd.s32 4294967294, %s2846_s30   ;;  %s2846_s30 = sphi %s2907_s30, %s3957_s30   ;;  %s2842_s29 = sphi %s2905_s29, %s3956_s29   ;;  %s2838_s28 = sphi %s2903_s28, %s3955_s28   ;;  %s2834_s27 = sphi %s2901_s27, %s3954_s27  }
   0x4   : > { %s2926_s11 = sadd.s32 1, %s2846_s30   ;;  %s201_s12 = sadd.s32 1, %s2842_s29 }
   0x5   : > { %s198_s13 = ssub.s32 %s2846_s30, %s2926_s11  ;;  %p211_p0 = scmp.ne.s32.totalorder %s2842_s29, %s2838_s28 }
   0x6   : > { %p199_p1 = scmp.eq.s32.totalorder %s198_s13, 0  ;;  %p212_p2 = scmp.eq.s32.totalorder %s2922_s9, 1 }
   0x7   : > { %p217_p3 = scmp.ne.s32.totalorder %s2838_s28, %s2834_s27  ;;  %p218_p4 = scmp.eq.s32.totalorder %s2389_s10, 1 }
   0x8   : > { %s2937_s14 = scalar_select %p199_p1, %s2842_s29, %s201_s12  }
   0x9   : > { %p2939_p5 = por %p212_p2, %p211_p0  ;;  %p2943_p6 = por %p218_p4, %p217_p3 }
   0xa   : > { %p2392_p7 = scmp.ge.s32.totalorder %s2846_s30, 1  ;;  %p265_p8 = scmp.lt.s32.totalorder %s2846_s30, 3 }
   0xc   : > { %p266_p9 = pnand %p2392_p7, %p265_p8 }
   0xe   : > { %269 = sbr.rel (%p266_p9) target bundleno = 2263 (0x8d7), region = 52 }
  0x15   : > { %p299_p10 = scmp.lt.s32.totalorder %s2922_s9, 1  ;;  %v402_v48 = vld [vmem:[%s3876_s1] sm:$0xff]  ;;  %vm410_vm0 = vcmask 523264   ;;  %vm385_vm1 = vcmask 7168   ;;  %s2848_s26 = smov 1  }
  0x16   : > { %2509 = vmatprep.mubr.msk.f32.mxu0 %vm410_vm0, %v402_v48  ;;  %s296_s13 = sand.u32 1, %s2838_s28   ;;  %s2853_s25 = smov [#allocation2]  }
  0x17   : > { %s300_s17 = scalar_select %p299_p10, %s2922_s9, 1 }
  0x18   : > { %s2788_s10 = sshll.u32 %s2853_s25, 4  ;;  %s2789_s10 = int_to_ptr.vmem [resolvable:$false] %s2788_s10 }
  0x19   : > { %s2475_s18 = sshll.u32 %s300_s17, 7  ;;  %s2393_s17 = sshll.u32 %s296_s13, 7 }
  0x1a   : > { %s2954_s21 = scalar_lea.vmem %s3875_s0, %s2475_s18  ;;  %s3791_s18 = scalar_lea.vmem [#allocation2], %s2393_s17 }
  0x1b   : > { %v2957_v0 = vld [vmem:[%s2954_s21 + $0x30] sm:$0xff]  ;;  %v2960_v1 = vld [vmem:[%s2954_s21 + $0x38] sm:$0xff]  ;;  %v2963_v2 = vld [vmem:[%s2954_s21] sm:$0xff]  ;;  %s2327_s19 = sshll.u32 %s3791_s18, 4  ;;  %s2790_s12 = scalar_lea.vmem %s2789_s10, 4096  ;;  %s3826_s19 = int_to_ptr.vmem [resolvable:$true] %s2327_s19 }
  0x1c   : > { %v330_v3 = vadd.f32 %v2960_v1, %v2957_v0  ;;  %v2968_v4 = vld [vmem:[%s2954_s21 + $0x8] sm:$0xff]  ;;  %v345_v5 = vmul.f32 %v2963_v2, %v2963_v2  ;;  %v2973_v6 = vld [vmem:[%s2954_s21 + $0x10] sm:$0xff]  ;;  %v2976_v7 = vld [vmem:[%s2954_s21 + $0x18] sm:$0xff]  ;;  %v351_v17 = vmul.f32 %v2957_v0, %v2957_v0  ;;  %v352_v18 = vmul.f32 %v2960_v1, %v2960_v1  ;;  %s2784_s24 = scalar_lea.vmem %s3826_s19, 2048  ;;  %p2791_p0 = scmp.lt.s32.totalorder %s3826_s19, %s2789_s10 }
  0x1d   : > { %v321_v8 = vadd.f32 %v2968_v4, %v2963_v2  ;;  %v346_v9 = vmul.f32 %v2968_v4, %v2968_v4  ;;  %v347_v10 = vmul.f32 %v2973_v6, %v2973_v6  ;;  %v348_v11 = vmul.f32 %v2976_v7, %v2976_v7  ;;  %v2989_v14 = vld [vmem:[%s2954_s21 + $0x20] sm:$0xff]  ;;  %v2992_v15 = vld [vmem:[%s2954_s21 + $0x28] sm:$0xff]  ;;  %v3005_v24 = vld [vmem:[%s2954_s21 + $0x50] sm:$0xff]  ;;  %p2785_p11 = scmp.ne.s32.totalorder %s3826_s19, %s2784_s24  ;;  %p2792_p1 = scmp.lt.s32.totalorder %s2790_s12, %s2784_s24 }
  0x1e   : > { %331 = vadd.xlane.f32.xlu1 %v330_v3  ;;  %v324_v13 = vadd.f32 %v2976_v7, %v2973_v6  ;;  %v327_v19 = vadd.f32 %v2992_v15, %v2989_v14  ;;  %v349_v20 = vmul.f32 %v2989_v14, %v2989_v14  ;;  %v350_v21 = vmul.f32 %v2992_v15, %v2992_v15  ;;  %v3008_v25 = vld [vmem:[%s2954_s21 + $0x58] sm:$0xff]  ;;  %v3011_v26 = vld [vmem:[%s2954_s21 + $0x40] sm:$0xff]  ;;  %v3014_v27 = vld [vmem:[%s2954_s21 + $0x48] sm:$0xff] }
  0x1f   : > { %322 = vadd.xlane.f32.xlu0 %v321_v8  ;;  %v361_v12 = vadd.f32 %v346_v9, %v345_v5  ;;  %v364_v16 = vadd.f32 %v348_v11, %v347_v10  ;;  %v370_v22 = vadd.f32 %v352_v18, %v351_v17  ;;  %v336_v28 = vadd.f32 %v3008_v25, %v3005_v24  ;;  %v3029_v36 = vld [vmem:[%s2954_s21 + $0x70] sm:$0xff]  ;;  %v3032_v37 = vld [vmem:[%s2954_s21 + $0x78] sm:$0xff]  ;;  %v3035_v38 = vld [vmem:[%s2954_s21 + $0x60] sm:$0xff]  ;;  %p2786_p12 = pnand %p2785_p11, %p2939_p5  ;;  %p2793_p2 = por %p2792_p1, %p2791_p0 }
  0x20   : > { %v367_v23 = vadd.f32 %v350_v21, %v349_v20  ;;  %v355_v29 = vmul.f32 %v3005_v24, %v3005_v24  ;;  %v356_v30 = vmul.f32 %v3008_v25, %v3008_v25  ;;  %v333_v31 = vadd.f32 %v3014_v27, %v3011_v26  ;;  %v3038_v39 = vld [vmem:[%s2954_s21 + $0x68] sm:$0xff] }
  0x21   : > { %v353_v32 = vmul.f32 %v3011_v26, %v3011_v26  ;;  %v354_v33 = vmul.f32 %v3014_v27, %v3014_v27  ;;  %v342_v40 = vadd.f32 %v3032_v37, %v3029_v36  ;;  %v359_v41 = vmul.f32 %v3029_v36, %v3029_v36  ;;  %p2787_p13 = pneg %p2786_p12 }
  0x22   : > { %362 = vadd.xlane.f32.xlu1 %v361_v12  ;;  %v376_v34 = vadd.f32 %v356_v30, %v355_v29  ;;  %v360_v42 = vmul.f32 %v3032_v37, %v3032_v37  ;;  %v339_v43 = vadd.f32 %v3038_v39, %v3035_v38  ;;  %v357_v44 = vmul.f32 %v3035_v38, %v3035_v38 }
  0x23   : > { %325 = vadd.xlane.f32.xlu0 %v324_v13  ;;  %v373_v35 = vadd.f32 %v354_v33, %v353_v32  ;;  %v358_v45 = vmul.f32 %v3038_v39, %v3038_v39  ;;  %v403_v33 = vld [vmem:[%s3876_s1 + $0x8] sm:$0xff]  ;;  %p2794_p3 = pnand %p2793_p2, %p2787_p13 }
  0x24   : > { %v382_v46 = vadd.f32 %v360_v42, %v359_v41  ;;  %v407_v41 = vld [vmem:[%s3876_s1 + $0x28] sm:$0xff]  ;;  %v408_v42 = vld [vmem:[%s3876_s1 + $0x30] sm:$0xff] }
  0x25   : > { %v379_v47 = vadd.f32 %v358_v45, %v357_v44 }
  0x26   : > { %365 = vadd.xlane.f32.xlu1 %v364_v16 }
  0x27   : > { %328 = vadd.xlane.f32.xlu0 %v327_v19 }
  0x2a   : > { %371 = vadd.xlane.f32.xlu1 %v370_v22 }
  0x2b   : > { %368 = vadd.xlane.f32.xlu0 %v367_v23 }
  0x2e   : > { %337 = vadd.xlane.f32.xlu1 %v336_v28 }
  0x2f   : > { %334 = vadd.xlane.f32.xlu0 %v333_v31 }
  0x32   : > { %377 = vadd.xlane.f32.xlu1 %v376_v34  ;;  %v404_v34 = vld [vmem:[%s3876_s1 + $0x10] sm:$0xff] }
  0x33   : > { %374 = vadd.xlane.f32.xlu0 %v373_v35  ;;  %v405_v35 = vld [vmem:[%s3876_s1 + $0x18] sm:$0xff] }
  0x36   : > { %343 = vadd.xlane.f32.xlu1 %v342_v40  ;;  %v406_v40 = vld [vmem:[%s3876_s1 + $0x20] sm:$0xff] }
  0x37   : > { %340 = vadd.xlane.f32.xlu0 %v339_v43  ;;  %v409_v43 = vld [vmem:[%s3876_s1 + $0x38] sm:$0xff] }
  0x3a   : > { %383 = vadd.xlane.f32.xlu1 %v382_v46 }
  0x3b   : > { %380 = vadd.xlane.f32.xlu0 %v379_v47 }
  0xab   : > { %v332_v49 = vpop.xlane.xlu1 %331 }
  0xac   : > { %v323_v50 = vpop.xlane.xlu0 %322 }
  0xaf   : > { %v363_v51 = vpop.xlane.xlu1 %362 }
  0xb0   : > { %v326_v52 = vpop.xlane.xlu0 %325  ;;  %v386_v53 = vsel %vm385_vm1, %v323_v50, %v363_v51 }
  0xb1   : > { %v394_v57 = vmul.f32 0.00390625, %v386_v53 }
  0xb3   : > { %v366_v54 = vpop.xlane.xlu1 %365 }
  0xb4   : > { %v387_v55 = vsel %vm385_vm1, %v326_v52, %v366_v54  ;;  %v329_v56 = vpop.xlane.xlu0 %328 }
  0xb5   : > { %v395_v58 = vmul.f32 0.00390625, %v387_v55 }
  0xb7   : > { %v372_v59 = vpop.xlane.xlu1 %371  ;;  %v2521_v60 = vpack.c.bf16 %v395_v58, %v394_v57 }
  0xb8   : > { %v389_v61 = vsel %vm385_vm1, %v332_v49, %v372_v59  ;;  %v369_v62 = vpop.xlane.xlu0 %368 }
  0xb9   : > { %v397_v63 = vmul.f32 0.00390625, %v389_v61  ;;  %v388_v3 = vsel %vm385_vm1, %v329_v56, %v369_v62  ;;  %2522 = vmatprep.subr.bf16.mxu0 %v2521_v60  ;;  %v605_v61 = vld [vmem:[%s3877_s2 + $0x8] sm:$0xff]  ;;  %v606_v62 = vld [vmem:[%s3877_s2 + $0x10] sm:$0xff] }
  0xba   : > { %v396_v5 = vmul.f32 0.00390625, %v388_v3  ;;  %2524 = vmatpush3.bf16.msra.mxu0 %v2521_v60  ;;  %v604_v60 = vld [vmem:[%s3877_s2] sm:$0xff] }
  0xbb   : > { %v338_v8 = vpop.xlane.xlu1 %337  ;;  %v608_v3 = vld [vmem:[%s3877_s2 + $0x20] sm:$0xff] }
  0xbc   : > { %v335_v9 = vpop.xlane.xlu0 %334  ;;  %v2525_v10 = vpack.c.bf16 %v397_v63, %v396_v5  ;;  %v607_v63 = vld [vmem:[%s3877_s2 + $0x18] sm:$0xff]  ;;  %v2849_v5 = vmov 1  }
  0xbd   : > { %2599 = vset.pattern.permute.xlu0 %v2849_v5  ;;  %2600 = vset.pattern.permute.xlu1 %v2849_v5 }
  0xbe   : > { %2526 = vmatprep.subr.bf16.mxu0 %v2525_v10 }
  0xbf   : > { %2528 = vmatpush3.bf16.msra.mxu0 %v2525_v10  ;;  %v378_v11 = vpop.xlane.xlu1 %377  ;;  %v611_v10 = vld [vmem:[%s3877_s2 + $0x38] sm:$0xff] }
  0xc0   : > { %v391_v12 = vsel %vm385_vm1, %v338_v8, %v378_v11  ;;  %v375_v13 = vpop.xlane.xlu0 %374  ;;  %v609_v8 = vld [vmem:[%s3877_s2 + $0x28] sm:$0xff] }
  0xc1   : > { %v399_v16 = vmul.f32 0.00390625, %v391_v12  ;;  %v390_v17 = vsel %vm385_vm1, %v335_v9, %v375_v13  ;;  %v610_v9 = vld [vmem:[%s3877_s2 + $0x30] sm:$0xff] }
  0xc2   : > { %v398_v18 = vmul.f32 0.00390625, %v390_v17 }
  0xc3   : > { %v344_v19 = vpop.xlane.xlu1 %343 }
  0xc4   : > { %v341_v20 = vpop.xlane.xlu0 %340  ;;  %v2529_v21 = vpack.c.bf16 %v399_v16, %v398_v18 }
  0xc6   : > { %2530 = vmatprep.subr.bf16.mxu0 %v2529_v21 }
  0xc7   : > { %2532 = vmatpush3.bf16.msra.mxu0 %v2529_v21  ;;  %v384_v22 = vpop.xlane.xlu1 %383 }
  0xc8   : > { %v393_v23 = vsel %vm385_vm1, %v344_v19, %v384_v22  ;;  %v381_v28 = vpop.xlane.xlu0 %380 }
  0xc9   : > { %v401_v29 = vmul.f32 0.00390625, %v393_v23  ;;  %v392_v30 = vsel %vm385_vm1, %v341_v20, %v381_v28 }
  0xca   : > { %v400_v31 = vmul.f32 0.00390625, %v392_v30  ;;  %v3884_v30 = vmov 0  }
  0xcb   : > { %1129 = vmatprep.mubr.bf16.mxu1 %v3884_v30 }
  0xcc   : > { %v2533_v32 = vpack.c.bf16 %v401_v29, %v400_v31 }
  0xce   : > { %2534 = vmatprep.subr.bf16.mxu0 %v2533_v32 }
  0xcf   : > { %2536 = vmatpush3.bf16.msra.mxu0 %v2533_v32 }
  0xd2   : > { %2510 = vmatmul.mubr.msk.f32.vlgmr.msra.gmra.mrb[0].mxu0 %vm410_vm0, %v403_v33 }
  0xd3   : > { %2512 = vmatprep.mubr.msk.f32.mxu0 %vm410_vm0, %v404_v34 }
  0xd6   : > { %2513 = vmatmul.mubr.msk.f32.gmra.mrb[2].mxu0 %vm410_vm0, %v405_v35 }
  0xd7   : > { %2515 = vmatprep.mubr.msk.f32.mxu0 %vm410_vm0, %v406_v40 }
  0xda   : > { %2516 = vmatmul.mubr.msk.f32.gmra.mrb[4].mxu0 %vm410_vm0, %v407_v41 }
  0xdb   : > { %2518 = vmatprep.mubr.msk.f32.mxu0 %vm410_vm0, %v408_v42 }
  0xde   : > { %2519 = vmatmul.mubr.msk.f32.gmra.mrb[6].mxu0 %vm410_vm0, %v409_v43 }
 0x1a5   : > { %v3092_v44 = vpop.f32.mrb[0].mxu0 }
 0x1a6   : > { %v541_v45 = vmul.f32 %v3092_v44, %v3092_v44  ;;  %v3096_v46 = vpop.f32.mrb[1].mxu0 }
 0x1a7   : > { %v540_v47 = vmul.f32 %v3096_v46, %v3096_v46 }
 0x1a8   : > { %558 = vrot.lane.b32.xlu1 %v541_v45, %s2848_s26 }
 0x1a9   : > { %556 = vrot.lane.b32.xlu0 %v540_v47, %s2848_s26  ;;  %v3102_v48 = vpop.f32.mrb[2].mxu0 }
 0x1aa   : > { %v543_v49 = vmul.f32 %v3102_v48, %v3102_v48  ;;  %v3106_v50 = vpop.f32.mrb[3].mxu0 }
 0x1ab   : > { %v542_v52 = vmul.f32 %v3106_v50, %v3106_v50 }
 0x1ac   : > { %562 = vrot.lane.b32.xlu1 %v543_v49, %s2848_s26 }
 0x1ad   : > { %v3109_v51 = vpop.f32.mrb[4].mxu0 }
 0x1ae   : > { %v3113_v53 = vpop.f32.mrb[5].mxu0  ;;  %v545_v55 = vmul.f32 %v3109_v51, %v3109_v51 }
 0x1af   : > { %v544_v54 = vmul.f32 %v3113_v53, %v3113_v53 }
 0x1b0   : > { %560 = vrot.lane.b32.xlu1 %v542_v52, %s2848_s26 }
 0x1b1   : > { %564 = vrot.lane.b32.xlu0 %v544_v54, %s2848_s26  ;;  %v3121_v56 = vpop.f32.mrb[6].mxu0 }
 0x1b2   : > { %v3123_v57 = vpop.f32.mrb[7].mxu0  ;;  %v547_v59 = vmul.f32 %v3121_v56, %v3121_v56 }
 0x1b3   : > { %v546_v58 = vmul.f32 %v3123_v57, %v3123_v57 }
 0x1b4   : > { %566 = vrot.lane.b32.xlu1 %v545_v55, %s2848_s26 }
 0x1b5   : > { %568 = vrot.lane.b32.xlu0 %v546_v58, %s2848_s26 }
 0x1b8   : > { %570 = vrot.lane.b32.xlu1 %v547_v59, %s2848_s26 }
 0x1b9   : > { %620 = vrot.lane.b32.xlu0 %v604_v60, %s2848_s26 }
 0x1bc   : > { %622 = vrot.lane.b32.xlu1 %v605_v61, %s2848_s26 }
 0x1bd   : > { %624 = vrot.lane.b32.xlu0 %v606_v62, %s2848_s26 }
 0x1c0   : > { %626 = vrot.lane.b32.xlu1 %v607_v63, %s2848_s26 }
 0x1c1   : > { %628 = vrot.lane.b32.xlu0 %v608_v3, %s2848_s26 }
 0x1c4   : > { %630 = vrot.lane.b32.xlu1 %v609_v8, %s2848_s26 }
 0x1c5   : > { %632 = vrot.lane.b32.xlu0 %v610_v9, %s2848_s26 }
 0x1c8   : > { %634 = vrot.lane.b32.xlu1 %v611_v10, %s2848_s26  ;;  %s2851_s26 = smov 127  }
 0x21a   : > { %v559_v11 = vpop.permute.xlu1 %558 }
 0x21b   : > { %v557_v12 = vpop.permute.xlu0 %556  ;;  %v581_v13 = vsub.f32 %v3092_v44, %v559_v11 }
 0x21c   : > { %v580_v16 = vsub.f32 %v3096_v46, %v557_v12 }
 0x21d   : > { %v589_v19 = vadd.f32 1e-05, %v581_v13 }
 0x21e   : > { %v588_v17 = vadd.f32 1e-05, %v580_v16  ;;  %v563_v18 = vpop.permute.xlu1 %562 }
 0x21f   : > { %v583_v20 = vsub.f32 %v3102_v48, %v563_v18 }
 0x220   : > { %2620 = vrsqrt.f32 %v588_v17 }
 0x221   : > { %2622 = vrsqrt.f32 %v589_v19  ;;  %v591_v28 = vadd.f32 1e-05, %v583_v20 }
 0x222   : > { %v561_v21 = vpop.permute.xlu1 %560 }
 0x223   : > { %v582_v22 = vsub.f32 %v3106_v50, %v561_v21  ;;  %v565_v23 = vpop.permute.xlu0 %564 }
 0x224   : > { %v584_v29 = vsub.f32 %v3113_v53, %v565_v23 }
 0x225   : > { %v590_v31 = vadd.f32 1e-05, %v582_v22  ;;  %v652_v22 = vld [vmem:[%s3878_s3] sm:$0xff] }
 0x226   : > { %v592_v32 = vadd.f32 1e-05, %v584_v29  ;;  %v567_v33 = vpop.permute.xlu1 %566 }
 0x227   : > { %2624 = vrsqrt.f32 %v590_v31  ;;  %v585_v34 = vsub.f32 %v3109_v51, %v567_v33  ;;  %v569_v35 = vpop.permute.xlu0 %568  ;;  %v653_v31 = vld [vmem:[%s3878_s3 + $0x8] sm:$0xff] }
 0x228   : > { %2626 = vrsqrt.f32 %v591_v28  ;;  %v586_v40 = vsub.f32 %v3123_v57, %v569_v35  ;;  %v654_v35 = vld [vmem:[%s3878_s3 + $0x10] sm:$0xff] }
 0x229   : > { %2628 = vrsqrt.f32 %v592_v32  ;;  %v593_v41 = vadd.f32 1e-05, %v585_v34 }
 0x22a   : > { %v2621_v42 = vpop.eup %2620  ;;  %v594_v43 = vadd.f32 1e-05, %v586_v40  ;;  %v571_v45 = vpop.permute.xlu1 %570 }
 0x22b   : > { %2630 = vrsqrt.f32 %v593_v41  ;;  %v587_v47 = vsub.f32 %v3121_v56, %v571_v45  ;;  %v621_v49 = vpop.permute.xlu0 %620  ;;  %v2623_v55 = vpop.eup %2622 }
 0x22c   : > { %v644_v52 = vmul.f32 %v2621_v42, %v621_v49  ;;  %2632 = vrsqrt.f32 %v594_v43 }
 0x22d   : > { %v595_v54 = vadd.f32 1e-05, %v587_v47 }
 0x22e   : > { %v623_v58 = vpop.permute.xlu1 %622  ;;  %668 = vrot.lane.b32.xlu0 %v644_v52, %s2851_s26 }
 0x22f   : > { %2634 = vrsqrt.f32 %v595_v54  ;;  %v645_v59 = vmul.f32 %v2623_v55, %v623_v58  ;;  %v625_v60 = vpop.permute.xlu0 %624 }
 0x231   : > { %v2625_v61 = vpop.eup %2624  ;;  %670 = vrot.lane.b32.xlu1 %v645_v59, %s2851_s26 }
 0x232   : > { %v2627_v62 = vpop.eup %2626  ;;  %v646_v63 = vmul.f32 %v2625_v61, %v625_v60  ;;  %v627_v3 = vpop.permute.xlu1 %626 }
 0x233   : > { %v2629_v5 = vpop.eup %2628  ;;  %v647_v8 = vmul.f32 %v2627_v62, %v627_v3  ;;  %v629_v9 = vpop.permute.xlu0 %628 }
 0x234   : > { %672 = vrot.lane.b32.xlu0 %v646_v63, %s2851_s26  ;;  %v648_v11 = vmul.f32 %v2629_v5, %v629_v9  ;;  %v846_v5 = vld [vmem:[%s3880_s5 + $0x8] sm:$0xff] }
 0x235   : > { %v2631_v10 = vpop.eup %2630  ;;  %674 = vrot.lane.b32.xlu1 %v647_v8, %s2851_s26  ;;  %v850_v9 = vld [vmem:[%s3880_s5 + $0x28] sm:$0xff] }
 0x236   : > { %v631_v12 = vpop.permute.xlu1 %630  ;;  %v2633_v13 = vpop.eup %2632 }
 0x237   : > { %v649_v16 = vmul.f32 %v2631_v10, %v631_v12  ;;  %v633_v17 = vpop.permute.xlu0 %632  ;;  %v849_v10 = vld [vmem:[%s3880_s5 + $0x20] sm:$0xff]  ;;  %v851_v12 = vld [vmem:[%s3880_s5 + $0x30] sm:$0xff] }
 0x238   : > { %676 = vrot.lane.b32.xlu0 %v648_v11, %s2851_s26  ;;  %v650_v19 = vmul.f32 %v2633_v13, %v633_v17  ;;  %v854_v13 = vld [vmem:[%s3880_s5 + $0x48] sm:$0xff]  ;;  %v856_v17 = vld [vmem:[%s3880_s5 + $0x58] sm:$0xff] }
 0x239   : > { %v2635_v18 = vpop.eup %2634  ;;  %678 = vrot.lane.b32.xlu1 %v649_v16, %s2851_s26 }
 0x23a   : > { %v635_v20 = vpop.permute.xlu1 %634 }
 0x23b   : > { %v651_v21 = vmul.f32 %v2635_v18, %v635_v20  ;;  %v855_v18 = vld [vmem:[%s3880_s5 + $0x50] sm:$0xff]  ;;  %v857_v20 = vld [vmem:[%s3880_s5 + $0x60] sm:$0xff] }
 0x23c   : > { %680 = vrot.lane.b32.xlu0 %v650_v19, %s2851_s26 }
 0x23d   : > { %682 = vrot.lane.b32.xlu1 %v651_v21, %s2851_s26  ;;  %s2476_s26 = sshll.u32 %s2922_s9, 11  ;;  %s3834_s9 = scalar_lea.sflag [#allocation3], %s296_s13 }
 0x23e   : > { %s3824_s23 = scalar_lea.hbm %s3883_s8, %s2476_s26 }
 0x240   : > { %709 = vperm.xlu0 %2599, %v644_v52  }
 0x241   : > { %713 = vperm.xlu1 %2600, %v645_v59   ;;  %v658_v59 = vld [vmem:[%s3878_s3 + $0x30] sm:$0xff] }
 0x244   : > { %725 = vperm.xlu0 %2599, %v648_v11   ;;  %v852_v11 = vld [vmem:[%s3880_s5 + $0x38] sm:$0xff] }
 0x245   : > { %717 = vperm.xlu1 %2600, %v646_v63  }
 0x248   : > { %2601 = vset.pattern.permute.xlu0 %v3884_v30 }
 0x249   : > { %721 = vperm.xlu1 %2600, %v647_v8   ;;  %v847_v8 = vld [vmem:[%s3880_s5 + $0x10] sm:$0xff] }
 0x24d   : > { %729 = vperm.xlu1 %2600, %v649_v16   ;;  %v853_v16 = vld [vmem:[%s3880_s5 + $0x40] sm:$0xff] }
 0x251   : > { %737 = vperm.xlu1 %2600, %v651_v21   ;;  %v860_v21 = vld [vmem:[%s3880_s5 + $0x78] sm:$0xff] }
 0x255   : > { %733 = vperm.xlu1 %2600, %v650_v19   ;;  %v858_v19 = vld [vmem:[%s3880_s5 + $0x68] sm:$0xff] }
 0x259   : > { %2602 = vset.pattern.permute.xlu1 %v3884_v30 }
 0x2a0   : > { %v669_v23 = vpop.permute.xlu0 %668 }
 0x2a1   : > { %v692_v28 = vmul.f32 %v669_v23, %v3096_v46  ;;  %v655_v46 = vld [vmem:[%s3878_s3 + $0x18] sm:$0xff] }
 0x2a3   : > { %v700_v29 = vsub.f32 %v652_v22, %v692_v28  ;;  %v671_v32 = vpop.permute.xlu1 %670  ;;  %v859_v22 = vld [vmem:[%s3880_s5 + $0x70] sm:$0xff] }
 0x2a4   : > { %v693_v33 = vmul.f32 %v3092_v44, %v671_v32  ;;  %v656_v44 = vld [vmem:[%s3878_s3 + $0x20] sm:$0xff] }
 0x2a5   : > { %758 = vperm.xlu1 %2602, %v700_v29  }
 0x2a6   : > { %v701_v34 = vsub.f32 %v653_v31, %v693_v33  ;;  %v673_v40 = vpop.permute.xlu0 %672 }
 0x2a7   : > { %v694_v41 = vmul.f32 %v673_v40, %v3106_v50  ;;  %v675_v42 = vpop.permute.xlu1 %674  ;;  %v657_v50 = vld [vmem:[%s3878_s3 + $0x28] sm:$0xff] }
 0x2a8   : > { %v695_v43 = vmul.f32 %v3102_v48, %v675_v42  ;;  %763 = vperm.xlu0 %2601, %v701_v34  }
 0x2a9   : > { %v702_v45 = vsub.f32 %v654_v35, %v694_v41 }
 0x2aa   : > { %v703_v47 = vsub.f32 %v655_v46, %v695_v43  ;;  %v677_v49 = vpop.permute.xlu0 %676 }
 0x2ab   : > { %v696_v52 = vmul.f32 %v677_v49, %v3113_v53  ;;  %v679_v54 = vpop.permute.xlu1 %678  ;;  %v659_v53 = vld [vmem:[%s3878_s3 + $0x38] sm:$0xff] }
 0x2ac   : > { %v697_v55 = vmul.f32 %v3109_v51, %v679_v54  ;;  %773 = vperm.xlu1 %2602, %v703_v47   ;;  %768 = vperm.xlu0 %2601, %v702_v45  }
 0x2ad   : > { %v704_v48 = vsub.f32 %v656_v44, %v696_v52 }
 0x2ae   : > { %v705_v58 = vsub.f32 %v657_v50, %v697_v55  ;;  %v681_v60 = vpop.permute.xlu0 %680 }
 0x2af   : > { %v698_v61 = vmul.f32 %v681_v60, %v3123_v57  ;;  %v683_v62 = vpop.permute.xlu1 %682  ;;  %v845_v57 = vld [vmem:[%s3880_s5] sm:$0xff] }
 0x2b0   : > { %v699_v63 = vmul.f32 %v3121_v56, %v683_v62  ;;  %783 = vperm.xlu0 %2601, %v705_v58   ;;  %778 = vperm.xlu1 %2602, %v704_v48   ;;  %v848_v56 = vld [vmem:[%s3880_s5 + $0x18] sm:$0xff] }
 0x2b1   : > { %v706_v51 = vsub.f32 %v658_v59, %v698_v61 }
 0x2b2   : > { %v707_v3 = vsub.f32 %v659_v53, %v699_v63 }
 0x2b4   : > { %793 = vperm.xlu1 %2602, %v707_v3   ;;  %788 = vperm.xlu0 %2601, %v706_v51  }
 0x2b8   : > { %877 = vperm.xlu1 %2602, %v846_v5   ;;  %872 = vperm.xlu0 %2601, %v845_v57  }
 0x2bc   : > { %887 = vperm.xlu1 %2602, %v848_v56   ;;  %882 = vperm.xlu0 %2601, %v847_v8  }
 0x2bf   : > { %v710_v33 = vpop.permute.xlu0 %709 }
 0x2c0   : > { %897 = vperm.xlu1 %2602, %v850_v9   ;;  %892 = vperm.xlu0 %2601, %v849_v10   ;;  %v714_v23 = vpop.permute.xlu1 %713  ;;  %v740_v41 = vmul.f32 %v710_v33, %v2963_v2  ;;  %v741_v46 = vmul.f32 %v710_v33, %v2968_v4 }
 0x2c1   : > { %v742_v42 = vmul.f32 %v714_v23, %v2973_v6  ;;  %v743_v43 = vmul.f32 %v714_v23, %v2976_v7  ;;  %v2610_v23 = vld [vmem:[%s3879_s4 + $0x38] sm:$0xff]  }
 0x2c3   : > { %v726_v35 = vpop.permute.xlu0 %725 }
 0x2c4   : > { %907 = vperm.xlu1 %2602, %v852_v11   ;;  %902 = vperm.xlu0 %2601, %v851_v12   ;;  %v718_v28 = vpop.permute.xlu1 %717  ;;  %v748_v53 = vmul.f32 %v726_v35, %v3011_v26  ;;  %v749_v62 = vmul.f32 %v726_v35, %v3014_v27 }
 0x2c5   : > { %v744_v50 = vmul.f32 %v718_v28, %v2989_v14  ;;  %v745_v54 = vmul.f32 %v718_v28, %v2992_v15  ;;  %v2852_v28 = vmov 0.0  }
 0x2c6   : > { %1492 = vmatprep.mubr.f32.mxu0 %v2852_v28 }
 0x2c8   : > { %917 = vperm.xlu1 %2602, %v854_v13   ;;  %912 = vperm.xlu0 %2601, %v853_v16   ;;  %v722_v29 = vpop.permute.xlu1 %721 }
 0x2c9   : > { %v746_v55 = vmul.f32 %v722_v29, %v2957_v0  ;;  %v747_v48 = vmul.f32 %v722_v29, %v2960_v1 }
 0x2cc   : > { %927 = vperm.xlu1 %2602, %v856_v17   ;;  %922 = vperm.xlu0 %2601, %v855_v18   ;;  %v730_v31 = vpop.permute.xlu1 %729 }
 0x2cd   : > { %v750_v14 = vmul.f32 %v730_v31, %v3005_v24  ;;  %v751_v0 = vmul.f32 %v730_v31, %v3008_v25 }
 0x2d0   : > { %937 = vperm.xlu1 %2602, %v858_v19   ;;  %932 = vperm.xlu0 %2601, %v857_v20   ;;  %v738_v32 = vpop.permute.xlu1 %737  ;;  %v2607_v20 = vld [vmem:[%s3879_s4 + $0x20] sm:$0xff]  }
 0x2d1   : > { %v754_v8 = vmul.f32 %v738_v32, %v3029_v36  ;;  %v755_v26 = vmul.f32 %v738_v32, %v3032_v37  ;;  %v2603_v36 = vld [vmem:[%s3879_s4] sm:$0xff]   ;;  %v2604_v37 = vld [vmem:[%s3879_s4 + $0x8] sm:$0xff]  }
 0x2d4   : > { %947 = vperm.xlu1 %2602, %v860_v21   ;;  %942 = vperm.xlu0 %2601, %v859_v22   ;;  %v734_v34 = vpop.permute.xlu1 %733  ;;  %v2608_v21 = vld [vmem:[%s3879_s4 + $0x28] sm:$0xff]   ;;  %v2609_v22 = vld [vmem:[%s3879_s4 + $0x30] sm:$0xff]  }
 0x2d5   : > { %v752_v27 = vmul.f32 %v734_v34, %v3035_v38  ;;  %v753_v24 = vmul.f32 %v734_v34, %v3038_v39  ;;  %v2605_v38 = vld [vmem:[%s3879_s4 + $0x10] sm:$0xff]   ;;  %v2606_v39 = vld [vmem:[%s3879_s4 + $0x18] sm:$0xff]  }
 0x324   : > { %v759_v40 = vpop.permute.xlu1 %758 }
 0x325   : > { %v797_v47 = vadd.f32 %v759_v40, %v741_v46  ;;  %v796_v49 = vadd.f32 %v759_v40, %v740_v41 }
 0x327   : > { %v764_v45 = vpop.permute.xlu0 %763 }
 0x328   : > { %v799_v44 = vadd.f32 %v764_v45, %v743_v43  ;;  %v798_v52 = vadd.f32 %v764_v45, %v742_v42 }
 0x32a   : > { %v813_v2 = vpack.c.bf16 %v799_v44, %v797_v47  ;;  %v812_v58 = vpack.c.bf16 %v798_v52, %v796_v49 }
 0x32b   : > { %v774_v4 = vpop.permute.xlu1 %773  ;;  %v769_v59 = vpop.permute.xlu0 %768 }
 0x32c   : > { %v802_v6 = vadd.f32 %v774_v4, %v746_v55  ;;  %v803_v60 = vadd.f32 %v774_v4, %v747_v48  ;;  %v800_v7 = vadd.f32 %v769_v59, %v744_v50  ;;  %v801_v61 = vadd.f32 %v769_v59, %v745_v54  ;;  %1097 = vmatprep.subr.bf16.mxu1 %v813_v2 }
 0x32d   : > { %1098 = vmatpush1.bf16.msra.mxu1 %v812_v58 }
 0x32e   : > { %v815_v15 = vpack.c.bf16 %v803_v60, %v801_v61  ;;  %v814_v1 = vpack.c.bf16 %v802_v6, %v800_v7 }
 0x32f   : > { %v779_v63 = vpop.permute.xlu1 %778  ;;  %v784_v51 = vpop.permute.xlu0 %783 }
 0x330   : > { %v804_v3 = vadd.f32 %v779_v63, %v748_v53  ;;  %v805_v5 = vadd.f32 %v779_v63, %v749_v62  ;;  %v806_v57 = vadd.f32 %v784_v51, %v750_v14  ;;  %v807_v56 = vadd.f32 %v784_v51, %v751_v0  ;;  %1099 = vmatprep.subr.bf16.mxu1 %v815_v15 }
 0x331   : > { %1100 = vmatpush1.bf16.msra.mxu1 %v814_v1 }
 0x332   : > { %v817_v9 = vpack.c.bf16 %v807_v56, %v805_v5  ;;  %v816_v25 = vpack.c.bf16 %v806_v57, %v804_v3 }
 0x333   : > { %v794_v10 = vpop.permute.xlu1 %793  ;;  %v789_v11 = vpop.permute.xlu0 %788 }
 0x334   : > { %v810_v12 = vadd.f32 %v794_v10, %v754_v8  ;;  %v811_v13 = vadd.f32 %v794_v10, %v755_v26  ;;  %v808_v16 = vadd.f32 %v789_v11, %v752_v27  ;;  %v809_v17 = vadd.f32 %v789_v11, %v753_v24  ;;  %1101 = vmatprep.subr.bf16.mxu1 %v817_v9 }
 0x335   : > { %1102 = vmatpush1.bf16.msra.mxu1 %v816_v25 }
 0x336   : > { %v819_v18 = vpack.c.bf16 %v811_v13, %v809_v17  ;;  %v818_v19 = vpack.c.bf16 %v810_v12, %v808_v16 }
 0x337   : > { %v873_v29 = vpop.permute.xlu0 %872  ;;  %v878_v41 = vpop.permute.xlu1 %877 }
 0x338   : > { %1103 = vmatprep.subr.bf16.mxu1 %v819_v18 }
 0x339   : > { %1104 = vmatpush1.bf16.msra.mxu1 %v818_v19 }
 0x33b   : > { %v883_v43 = vpop.permute.xlu0 %882  ;;  %v888_v54 = vpop.permute.xlu1 %887 }
 0x33c   : > { %2417 = vmatmul.mubr.msk.bf16.vlgmr.msra.gmra.mrb[0].mxu1 %vm410_vm0, %v2603_v36 }
 0x33d   : > { %1139 = vmatprep.mubr.bf16.mxu1 %v3884_v30 }
 0x33f   : > { %v893_v2 = vpop.permute.xlu0 %892  ;;  %v898_v61 = vpop.permute.xlu1 %897 }
 0x343   : > { %v903_v14 = vpop.permute.xlu0 %902  ;;  %v908_v3 = vpop.permute.xlu1 %907 }
 0x344   : > { %2418 = vmatmul.mubr.msk.bf16.gmra.mrb[4].mxu1 %vm410_vm0, %v2604_v37 }
 0x345   : > { %1149 = vmatprep.mubr.bf16.mxu1 %v3884_v30 }
 0x347   : > { %v918_v26 = vpop.permute.xlu1 %917  ;;  %v913_v24 = vpop.permute.xlu0 %912 }
 0x34b   : > { %v928_v19 = vpop.permute.xlu1 %927  ;;  %v923_v37 = vpop.permute.xlu0 %922 }
 0x34c   : > { %2419 = vmatmul.mubr.msk.bf16.gmra.mrb[8].mxu1 %vm410_vm0, %v2605_v38 }
 0x34d   : > { %1159 = vmatprep.mubr.bf16.mxu1 %v3884_v30 }
 0x354   : > { %2420 = vmatmul.mubr.msk.bf16.gmra.mrb[12].mxu1 %vm410_vm0, %v2606_v39 }
 0x355   : > { %1169 = vmatprep.mubr.bf16.mxu1 %v3884_v30 }
 0x35c   : > { %2421 = vmatmul.mubr.msk.bf16.gmra.mrb[16].mxu1 %vm410_vm0, %v2607_v20 }
 0x35d   : > { %1179 = vmatprep.mubr.bf16.mxu1 %v3884_v30 }
 0x364   : > { %2422 = vmatmul.mubr.msk.bf16.gmra.mrb[20].mxu1 %vm410_vm0, %v2608_v21 }
 0x365   : > { %1189 = vmatprep.mubr.bf16.mxu1 %v3884_v30 }
 0x36c   : > { %2423 = vmatmul.mubr.msk.bf16.gmra.mrb[24].mxu1 %vm410_vm0, %v2609_v22 }
 0x36d   : > { %1199 = vmatprep.mubr.bf16.mxu1 %v3884_v30 }
 0x374   : > { %2424 = vmatmul.mubr.msk.bf16.gmra.mrb[28].mxu1 %vm410_vm0, %v2610_v23 }
 0x375   : > { %1209 = vmatprep.mubr.bf16.mxu1 %v3884_v30 }
 0x40f   : > { %v1131_v31 = vpop.f32.mrb[0].mxu1 }
 0x410   : > { %v1132_v32 = vadd.f32 %v1131_v31, %v873_v29  ;;  %v1133_v33 = vpop.f32.mrb[1].mxu1 }
 0x411   : > { %v1134_v34 = vadd.f32 %v1133_v33, %v873_v29  ;;  %v1135_v35 = vpop.f32.mrb[2].mxu1  ;;  %v938_v33 = vpop.permute.xlu1 %937 }
 0x412   : > { %v1137_v40 = vpop.f32.mrb[3].mxu1  ;;  %1268 = vxpose.xlu0.b32.start [1/8] (short) %v1132_v32, 128  ;;  %v1136_v46 = vadd.f32 %v1135_v35, %v878_v41  ;;  %v933_v35 = vpop.permute.xlu0 %932 }
 0x413   : > { %1300 = vxpose.xlu1.b32.start [1/8] (short) %v1134_v34, 128  ;;  %v1138_v42 = vadd.f32 %v1137_v40, %v878_v41 }
 0x416   : > { %1269 = vxpose.xlu0.b32.cont [2/8] (short) %v1136_v46, 128 }
 0x417   : > { %v1141_v45 = vpop.f32.mrb[4].mxu1  ;;  %1301 = vxpose.xlu1.b32.cont [2/8] (short) %v1138_v42, 128 }
 0x418   : > { %v1142_v47 = vadd.f32 %v1141_v45, %v883_v43  ;;  %v1143_v44 = vpop.f32.mrb[5].mxu1 }
 0x419   : > { %v1144_v49 = vadd.f32 %v1143_v44, %v883_v43  ;;  %v1145_v52 = vpop.f32.mrb[6].mxu1 }
 0x41a   : > { %v1147_v50 = vpop.f32.mrb[7].mxu1  ;;  %1270 = vxpose.xlu0.b32.cont [3/8] (short) %v1142_v47, 128  ;;  %v1146_v55 = vadd.f32 %v1145_v52, %v888_v54  ;;  %v948_v52 = vpop.permute.xlu1 %947 }
 0x41b   : > { %1302 = vxpose.xlu1.b32.cont [3/8] (short) %v1144_v49, 128  ;;  %v1148_v48 = vadd.f32 %v1147_v50, %v888_v54  ;;  %v943_v54 = vpop.permute.xlu0 %942 }
 0x41e   : > { %1271 = vxpose.xlu0.b32.cont [4/8] (short) %v1146_v55, 128 }
 0x41f   : > { %v1151_v58 = vpop.f32.mrb[8].mxu1  ;;  %1303 = vxpose.xlu1.b32.cont [4/8] (short) %v1148_v48, 128 }
 0x420   : > { %v1152_v4 = vadd.f32 %v1151_v58, %v893_v2  ;;  %v1153_v59 = vpop.f32.mrb[9].mxu1 }
 0x421   : > { %v1154_v6 = vadd.f32 %v1153_v59, %v893_v2  ;;  %v1155_v60 = vpop.f32.mrb[10].mxu1 }
 0x422   : > { %v1157_v7 = vpop.f32.mrb[11].mxu1  ;;  %1272 = vxpose.xlu0.b32.cont [5/8] (short) %v1152_v4, 128  ;;  %v1156_v53 = vadd.f32 %v1155_v60, %v898_v61 }
 0x423   : > { %1304 = vxpose.xlu1.b32.cont [5/8] (short) %v1154_v6, 128  ;;  %v1158_v62 = vadd.f32 %v1157_v7, %v898_v61 }
 0x426   : > { %1273 = vxpose.xlu0.b32.cont [6/8] (short) %v1156_v53, 128 }
 0x427   : > { %v1161_v0 = vpop.f32.mrb[12].mxu1  ;;  %1305 = vxpose.xlu1.b32.cont [6/8] (short) %v1158_v62, 128 }
 0x428   : > { %v1162_v15 = vadd.f32 %v1161_v0, %v903_v14  ;;  %v1163_v1 = vpop.f32.mrb[13].mxu1 }
 0x429   : > { %v1164_v63 = vadd.f32 %v1163_v1, %v903_v14  ;;  %v1165_v51 = vpop.f32.mrb[14].mxu1 }
 0x42a   : > { %v1167_v5 = vpop.f32.mrb[15].mxu1  ;;  %1274 = vxpose.xlu0.b32.cont [7/8] (short) %v1162_v15, 128  ;;  %v1166_v57 = vadd.f32 %v1165_v51, %v908_v3 }
 0x42b   : > { %1306 = vxpose.xlu1.b32.cont [7/8] (short) %v1164_v63, 128  ;;  %v1168_v56 = vadd.f32 %v1167_v5, %v908_v3 }
 0x42e   : > { %1275 = vxpose.xlu0.b32.end [8/8] (short) %v1166_v57, 128 }
 0x42f   : > { %v1171_v8 = vpop.f32.mrb[16].mxu1  ;;  %1307 = vxpose.xlu1.b32.end [8/8] (short) %v1168_v56, 128 }
 0x430   : > { %v1173_v27 = vpop.f32.mrb[17].mxu1  ;;  %v1172_v25 = vadd.f32 %v1171_v8, %v913_v24 }
 0x431   : > { %v1175_v9 = vpop.f32.mrb[18].mxu1  ;;  %v1174_v12 = vadd.f32 %v1173_v27, %v913_v24 }
 0x432   : > { %v1176_v10 = vadd.f32 %v1175_v9, %v918_v26  ;;  %v1177_v11 = vpop.f32.mrb[19].mxu1 }
 0x433   : > { %v1178_v13 = vadd.f32 %v1177_v11, %v918_v26 }
 0x434   : > { %v2539_v16 = vpack.c.bf16 %v1176_v10, %v1172_v25 }
 0x435   : > { %v2537_v17 = vpack.c.bf16 %v1178_v13, %v1174_v12 }
 0x437   : > { %v1181_v18 = vpop.f32.mrb[20].mxu1  ;;  %2538 = vmatprep.subr.bf16.mxu0 %v2537_v17 }
 0x438   : > { %v1183_v36 = vpop.f32.mrb[21].mxu1  ;;  %2540 = vmatpush1.bf16.msra.mxu0 %v2539_v16  ;;  %v1182_v39 = vadd.f32 %v1181_v18, %v923_v37 }
 0x439   : > { %v1185_v38 = vpop.f32.mrb[22].mxu1  ;;  %v1184_v22 = vadd.f32 %v1183_v36, %v923_v37 }
 0x43a   : > { %v1186_v20 = vadd.f32 %v1185_v38, %v928_v19  ;;  %v1187_v21 = vpop.f32.mrb[23].mxu1 }
 0x43b   : > { %v1188_v23 = vadd.f32 %v1187_v21, %v928_v19  ;;  %v2612_v21 = vld [vmem:[%s3879_s4 + $0x48] sm:$0xff]  }
 0x43c   : > { %v2543_v29 = vpack.c.bf16 %v1186_v20, %v1182_v39  ;;  %v2611_v20 = vld [vmem:[%s3879_s4 + $0x40] sm:$0xff]  }
 0x43d   : > { %v2541_v31 = vpack.c.bf16 %v1188_v23, %v1184_v22  ;;  %2425 = vmatmul.mubr.msk.bf16.gmra.mrb[32].mxu1 %vm410_vm0, %v2611_v20  ;;  %v2614_v22 = vld [vmem:[%s3879_s4 + $0x58] sm:$0xff]   ;;  %v2615_v23 = vld [vmem:[%s3879_s4 + $0x60] ss:$0 sps:$4 sm:$0x11]  }
 0x43e   : > { %1219 = vmatprep.mubr.bf16.mxu1 %v3884_v30 }
 0x43f   : > { %v1191_v32 = vpop.f32.mrb[24].mxu1  ;;  %2542 = vmatprep.subr.bf16.mxu0 %v2541_v31 }
 0x440   : > { %v1193_v34 = vpop.f32.mrb[25].mxu1  ;;  %2544 = vmatpush1.bf16.msra.mxu0 %v2543_v29  ;;  %v1192_v41 = vadd.f32 %v1191_v32, %v933_v35 }
 0x441   : > { %v1195_v40 = vpop.f32.mrb[26].mxu1  ;;  %v1194_v43 = vadd.f32 %v1193_v34, %v933_v35 }
 0x442   : > { %v1196_v46 = vadd.f32 %v1195_v40, %v938_v33  ;;  %v1197_v42 = vpop.f32.mrb[27].mxu1 }
 0x443   : > { %v1198_v45 = vadd.f32 %v1197_v42, %v938_v33 }
 0x444   : > { %v2547_v47 = vpack.c.bf16 %v1196_v46, %v1192_v41 }
 0x445   : > { %v2545_v44 = vpack.c.bf16 %v1198_v45, %v1194_v43  ;;  %2426 = vmatmul.mubr.msk.bf16.gmra.mrb[36].mxu1 %vm410_vm0, %v2612_v21 }
 0x446   : > { %1229 = vmatprep.mubr.bf16.mxu1 %v3884_v30 }
 0x447   : > { %v1201_v49 = vpop.f32.mrb[28].mxu1  ;;  %2546 = vmatprep.subr.bf16.mxu0 %v2545_v44 }
 0x448   : > { %v1203_v50 = vpop.f32.mrb[29].mxu1  ;;  %2548 = vmatpush1.bf16.msra.mxu0 %v2547_v47  ;;  %v1202_v48 = vadd.f32 %v1201_v49, %v943_v54 }
 0x449   : > { %v1205_v55 = vpop.f32.mrb[30].mxu1  ;;  %v1204_v4 = vadd.f32 %v1203_v50, %v943_v54 }
 0x44a   : > { %v1206_v2 = vadd.f32 %v1205_v55, %v948_v52  ;;  %v1207_v58 = vpop.f32.mrb[31].mxu1 }
 0x44b   : > { %v1208_v59 = vadd.f32 %v1207_v58, %v948_v52 }
 0x44c   : > { %v2551_v6 = vpack.c.bf16 %v1206_v2, %v1202_v48 }
 0x44d   : > { %v2549_v60 = vpack.c.bf16 %v1208_v59, %v1204_v4 }
 0x44f   : > { %2550 = vmatprep.subr.bf16.mxu0 %v2549_v60 }
 0x450   : > { %2552 = vmatpush1.bf16.msra.mxu0 %v2551_v6 }
 0x492   : > { %v1284_v7 = vpop.trf.xlu0 }
 0x493   : > { %2430 = vmatmul.mubr.msk.f32.vlgmr.msra.gmra.mrb[8].mxu0 %vm410_vm0, %v1284_v7  ;;  %v1316_v51 = vpop.trf.xlu1 }
 0x494   : > { %1498 = vmatprep.mubr.f32.mxu0 %v2852_v28 }
 0x496   : > { %v1285_v61 = vpop.trf.xlu0 }
 0x497   : > { %2431 = vmatmul.mubr.msk.f32.gmra.mrb[10].mxu0 %vm410_vm0, %v1285_v61  ;;  %v1317_v57 = vpop.trf.xlu1 }
 0x498   : > { %1504 = vmatprep.mubr.f32.mxu0 %v2852_v28 }
 0x49a   : > { %v1286_v53 = vpop.trf.xlu0 }
 0x49b   : > { %2432 = vmatmul.mubr.msk.f32.gmra.mrb[12].mxu0 %vm410_vm0, %v1286_v53  ;;  %v1318_v8 = vpop.trf.xlu1 }
 0x49c   : > { %1510 = vmatprep.mubr.f32.mxu0 %v2852_v28 }
 0x49e   : > { %v1287_v62 = vpop.trf.xlu0 }
 0x49f   : > { %2433 = vmatmul.mubr.msk.f32.gmra.mrb[14].mxu0 %vm410_vm0, %v1287_v62  ;;  %v1319_v24 = vpop.trf.xlu1 }
 0x4a0   : > { %1516 = vmatprep.mubr.f32.mxu0 %v2852_v28 }
 0x4a2   : > { %v1288_v14 = vpop.trf.xlu0 }
 0x4a3   : > { %2434 = vmatmul.mubr.msk.f32.gmra.mrb[16].mxu0 %vm410_vm0, %v1288_v14  ;;  %v1320_v25 = vpop.trf.xlu1 }
 0x4a4   : > { %1522 = vmatprep.mubr.f32.mxu0 %v2852_v28 }
 0x4a6   : > { %v1289_v0 = vpop.trf.xlu0 }
 0x4a7   : > { %2435 = vmatmul.mubr.msk.f32.gmra.mrb[18].mxu0 %vm410_vm0, %v1289_v0  ;;  %v1321_v11 = vpop.trf.xlu1 }
 0x4a8   : > { %1528 = vmatprep.mubr.f32.mxu0 %v2852_v28 }
 0x4aa   : > { %v1290_v15 = vpop.trf.xlu0 }
 0x4ab   : > { %2436 = vmatmul.mubr.msk.f32.gmra.mrb[20].mxu0 %vm410_vm0, %v1290_v15  ;;  %v1322_v12 = vpop.trf.xlu1 }
 0x4ac   : > { %1534 = vmatprep.mubr.f32.mxu0 %v2852_v28 }
 0x4ae   : > { %v1291_v1 = vpop.trf.xlu0 }
 0x4af   : > { %2437 = vmatmul.mubr.msk.f32.gmra.mrb[22].mxu0 %vm410_vm0, %v1291_v1  ;;  %v1323_v13 = vpop.trf.xlu1 }
 0x4b0   : > { %1540 = vmatprep.mubr.f32.mxu0 %v2852_v28 }
 0x4b2   : > { %v1292_v63 = vpop.trf.xlu0 }
 0x4b3   : > { %2438 = vmatmul.mubr.msk.f32.gmra.mrb[24].mxu0 %vm410_vm0, %v1292_v63  ;;  %v1324_v16 = vpop.trf.xlu1 }
 0x4b4   : > { %1546 = vmatprep.mubr.f32.mxu0 %v2852_v28 }
 0x4b6   : > { %v1293_v3 = vpop.trf.xlu0 }
 0x4b7   : > { %2439 = vmatmul.mubr.msk.f32.gmra.mrb[26].mxu0 %vm410_vm0, %v1293_v3  ;;  %v1325_v17 = vpop.trf.xlu1 }
 0x4b8   : > { %1552 = vmatprep.mubr.f32.mxu0 %v2852_v28 }
 0x4ba   : > { %v1294_v5 = vpop.trf.xlu0 }
 0x4bb   : > { %2440 = vmatmul.mubr.msk.f32.gmra.mrb[28].mxu0 %vm410_vm0, %v1294_v5  ;;  %v1326_v18 = vpop.trf.xlu1 }
 0x4bc   : > { %1558 = vmatprep.mubr.f32.mxu0 %v2852_v28 }
 0x4be   : > { %v1295_v56 = vpop.trf.xlu0 }
 0x4bf   : > { %2441 = vmatmul.mubr.msk.f32.gmra.mrb[30].mxu0 %vm410_vm0, %v1295_v56  ;;  %v1327_v19 = vpop.trf.xlu1 }
 0x4c0   : > { %1564 = vmatprep.mubr.f32.mxu0 %v2852_v28 }
 0x4c2   : > { %v1296_v26 = vpop.trf.xlu0 }
 0x4c3   : > { %2442 = vmatmul.mubr.msk.f32.gmra.mrb[32].mxu0 %vm410_vm0, %v1296_v26  ;;  %v1328_v36 = vpop.trf.xlu1 }
 0x4c4   : > { %1570 = vmatprep.mubr.f32.mxu0 %v2852_v28 }
 0x4c6   : > { %v1297_v27 = vpop.trf.xlu0 }
 0x4c7   : > { %2443 = vmatmul.mubr.msk.f32.gmra.mrb[34].mxu0 %vm410_vm0, %v1297_v27  ;;  %v1329_v37 = vpop.trf.xlu1 }
 0x4c8   : > { %1576 = vmatprep.mubr.f32.mxu0 %v2852_v28 }
 0x4ca   : > { %v1298_v9 = vpop.trf.xlu0 }
 0x4cb   : > { %2444 = vmatmul.mubr.msk.f32.gmra.mrb[36].mxu0 %vm410_vm0, %v1298_v9  ;;  %v1330_v38 = vpop.trf.xlu1 }
 0x4cc   : > { %1582 = vmatprep.mubr.f32.mxu0 %v2852_v28 }
 0x4ce   : > { %v1299_v10 = vpop.trf.xlu0 }
 0x4cf   : > { %2445 = vmatmul.mubr.msk.f32.gmra.mrb[38].mxu0 %vm410_vm0, %v1299_v10  ;;  %v1331_v39 = vpop.trf.xlu1 }
 0x4d0   : > { %1588 = vmatprep.mubr.f32.mxu0 %v2852_v28 }
 0x4d3   : > { %2446 = vmatmul.mubr.msk.f32.gmra.mrb[40].mxu0 %vm410_vm0, %v1316_v51 }
 0x4d4   : > { %1594 = vmatprep.mubr.f32.mxu0 %v2852_v28 }
 0x4d7   : > { %2447 = vmatmul.mubr.msk.f32.gmra.mrb[42].mxu0 %vm410_vm0, %v1317_v57 }
 0x4d8   : > { %1600 = vmatprep.mubr.f32.mxu0 %v2852_v28 }
 0x4db   : > { %2448 = vmatmul.mubr.msk.f32.gmra.mrb[44].mxu0 %vm410_vm0, %v1318_v8 }
 0x4dc   : > { %1606 = vmatprep.mubr.f32.mxu0 %v2852_v28 }
 0x4df   : > { %2449 = vmatmul.mubr.msk.f32.gmra.mrb[46].mxu0 %vm410_vm0, %v1319_v24 }
 0x4e0   : > { %1612 = vmatprep.mubr.f32.mxu0 %v2852_v28 }
 0x4e3   : > { %2450 = vmatmul.mubr.msk.f32.gmra.mrb[48].mxu0 %vm410_vm0, %v1320_v25 }
 0x4e4   : > { %1618 = vmatprep.mubr.f32.mxu0 %v2852_v28 }
 0x4e7   : > { %2451 = vmatmul.mubr.msk.f32.gmra.mrb[50].mxu0 %vm410_vm0, %v1321_v11 }
 0x4e8   : > { %1624 = vmatprep.mubr.f32.mxu0 %v2852_v28 }
 0x4eb   : > { %2452 = vmatmul.mubr.msk.f32.gmra.mrb[52].mxu0 %vm410_vm0, %v1322_v12 }
 0x4ec   : > { %1630 = vmatprep.mubr.f32.mxu0 %v2852_v28 }
 0x4ef   : > { %2453 = vmatmul.mubr.msk.f32.gmra.mrb[54].mxu0 %vm410_vm0, %v1323_v13 }
 0x4f0   : > { %1636 = vmatprep.mubr.f32.mxu0 %v2852_v28 }
 0x4f3   : > { %2454 = vmatmul.mubr.msk.f32.gmra.mrb[56].mxu0 %vm410_vm0, %v1324_v16 }
 0x4f4   : > { %1642 = vmatprep.mubr.f32.mxu0 %v2852_v28 }
 0x4f7   : > { %2455 = vmatmul.mubr.msk.f32.gmra.mrb[58].mxu0 %vm410_vm0, %v1325_v17 }
 0x4f8   : > { %1648 = vmatprep.mubr.f32.mxu0 %v2852_v28 }
 0x4fb   : > { %2456 = vmatmul.mubr.msk.f32.gmra.mrb[60].mxu0 %vm410_vm0, %v1326_v18 }
 0x4fc   : > { %1654 = vmatprep.mubr.f32.mxu0 %v2852_v28 }
 0x4ff   : > { %2457 = vmatmul.mubr.msk.f32.gmra.mrb[62].mxu0 %vm410_vm0, %v1327_v19 }
 0x500   : > { %1660 = vmatprep.mubr.f32.mxu0 %v2852_v28 }
 0x503   : > { %2458 = vmatmul.mubr.msk.f32.gmra.mrb[64].mxu0 %vm410_vm0, %v1328_v36 }
 0x504   : > { %1666 = vmatprep.mubr.f32.mxu0 %v2852_v28 }
 0x507   : > { %2459 = vmatmul.mubr.msk.f32.gmra.mrb[66].mxu0 %vm410_vm0, %v1329_v37 }
 0x508   : > { %1672 = vmatprep.mubr.f32.mxu0 %v2852_v28 }
 0x50b   : > { %2460 = vmatmul.mubr.msk.f32.gmra.mrb[68].mxu0 %vm410_vm0, %v1330_v38 }
 0x50c   : > { %1678 = vmatprep.mubr.f32.mxu0 %v2852_v28  ;;  %v2613_v28 = vld [vmem:[%s3879_s4 + $0x50] sm:$0xff]  }
 0x50d   : > { %2427 = vmatmul.mubr.msk.bf16.gmra.mrb[40].mxu1 %vm410_vm0, %v2613_v28 }
 0x50e   : > { %1239 = vmatprep.mubr.bf16.mxu1 %v3884_v30 }
 0x50f   : > { %2461 = vmatmul.mubr.msk.f32.gmra.mrb[70].mxu0 %vm410_vm0, %v1331_v39 }
 0x510   : > { %2240 = vmatprep.mubr.bf16.mxu0 %v3884_v30 }
 0x515   : > { %2428 = vmatmul.mubr.msk.bf16.gmra.mrb[44].mxu1 %vm410_vm0, %v2614_v22 }
 0x516   : > { %1249 = vmatprep.mubr.bf16.mxu1 %v3884_v30 }
 0x51d   : > { %2429 = vmatmul.mubr.msk.bf16.gmra.mrb[48].mxu1 %vm410_vm0, %v2615_v23 }
 0x566   : > { %v3400_v29 = vpop.f32.mrb[8].mxu0 }
 0x567   : > { %v3402_v31 = vpop.f32.mrb[9].mxu0 }
 0x568   : > { %v1685_v32 = vmax.f32 %v3400_v29, %v3402_v31 }
 0x56a   : > { %1686 = vmax.xlane.f32.xlu0 %v1685_v32  ;;  %v3406_v33 = vpop.f32.mrb[10].mxu0 }
 0x56b   : > { %v3408_v34 = vpop.f32.mrb[11].mxu0 }
 0x56c   : > { %v1688_v35 = vmax.f32 %v3406_v33, %v3408_v34 }
 0x56e   : > { %1689 = vmax.xlane.f32.xlu1 %v1688_v35  ;;  %v3412_v40 = vpop.f32.mrb[12].mxu0 }
 0x56f   : > { %v3414_v41 = vpop.f32.mrb[13].mxu0 }
 0x570   : > { %v1691_v46 = vmax.f32 %v3412_v40, %v3414_v41 }
 0x572   : > { %1692 = vmax.xlane.f32.xlu0 %v1691_v46  ;;  %v3418_v42 = vpop.f32.mrb[14].mxu0 }
 0x573   : > { %v3420_v43 = vpop.f32.mrb[15].mxu0 }
 0x574   : > { %v1694_v45 = vmax.f32 %v3418_v42, %v3420_v43 }
 0x576   : > { %1695 = vmax.xlane.f32.xlu0 %v1694_v45  ;;  %v3424_v47 = vpop.f32.mrb[16].mxu0 }
 0x577   : > { %v3426_v44 = vpop.f32.mrb[17].mxu0 }
 0x578   : > { %v1697_v49 = vmax.f32 %v3424_v47, %v3426_v44 }
 0x57a   : > { %1698 = vmax.xlane.f32.xlu0 %v1697_v49  ;;  %v3430_v52 = vpop.f32.mrb[18].mxu0 }
 0x57b   : > { %v3432_v50 = vpop.f32.mrb[19].mxu0 }
 0x57c   : > { %v1700_v54 = vmax.f32 %v3430_v52, %v3432_v50 }
 0x57e   : > { %1701 = vmax.xlane.f32.xlu1 %v1700_v54  ;;  %v3436_v55 = vpop.f32.mrb[20].mxu0 }
 0x57f   : > { %v3438_v48 = vpop.f32.mrb[21].mxu0 }
 0x580   : > { %v1703_v2 = vmax.f32 %v3436_v55, %v3438_v48 }
 0x582   : > { %1704 = vmax.xlane.f32.xlu0 %v1703_v2  ;;  %v3442_v58 = vpop.f32.mrb[22].mxu0 }
 0x583   : > { %v3444_v4 = vpop.f32.mrb[23].mxu0 }
 0x584   : > { %v1706_v59 = vmax.f32 %v3442_v58, %v3444_v4 }
 0x586   : > { %1707 = vmax.xlane.f32.xlu1 %v1706_v59  ;;  %v3448_v6 = vpop.f32.mrb[24].mxu0 }
 0x587   : > { %v3450_v60 = vpop.f32.mrb[25].mxu0 }
 0x588   : > { %v1709_v7 = vmax.f32 %v3448_v6, %v3450_v60 }
 0x58a   : > { %1710 = vmax.xlane.f32.xlu0 %v1709_v7  ;;  %v3454_v61 = vpop.f32.mrb[26].mxu0 }
 0x58b   : > { %v3456_v53 = vpop.f32.mrb[27].mxu0 }
 0x58c   : > { %v1712_v62 = vmax.f32 %v3454_v61, %v3456_v53 }
 0x58e   : > { %1713 = vmax.xlane.f32.xlu1 %v1712_v62  ;;  %v3460_v14 = vpop.f32.mrb[28].mxu0 }
 0x58f   : > { %v3462_v0 = vpop.f32.mrb[29].mxu0 }
 0x590   : > { %v1715_v15 = vmax.f32 %v3460_v14, %v3462_v0 }
 0x592   : > { %1716 = vmax.xlane.f32.xlu0 %v1715_v15  ;;  %v3466_v1 = vpop.f32.mrb[30].mxu0 }
 0x593   : > { %v3468_v63 = vpop.f32.mrb[31].mxu0 }
 0x594   : > { %v1718_v51 = vmax.f32 %v3466_v1, %v3468_v63 }
 0x596   : > { %1719 = vmax.xlane.f32.xlu1 %v1718_v51  ;;  %v3472_v3 = vpop.f32.mrb[32].mxu0 }
 0x597   : > { %v3474_v5 = vpop.f32.mrb[33].mxu0 }
 0x598   : > { %v1721_v57 = vmax.f32 %v3472_v3, %v3474_v5 }
 0x59a   : > { %1722 = vmax.xlane.f32.xlu0 %v1721_v57  ;;  %v3478_v56 = vpop.f32.mrb[34].mxu0 }
 0x59b   : > { %v3480_v8 = vpop.f32.mrb[35].mxu0 }
 0x59c   : > { %v1724_v26 = vmax.f32 %v3478_v56, %v3480_v8 }
 0x59e   : > { %1725 = vmax.xlane.f32.xlu1 %v1724_v26  ;;  %v3484_v27 = vpop.f32.mrb[36].mxu0 }
 0x59f   : > { %v3486_v24 = vpop.f32.mrb[37].mxu0 }
 0x5a0   : > { %v1727_v9 = vmax.f32 %v3484_v27, %v3486_v24 }
 0x5a2   : > { %1728 = vmax.xlane.f32.xlu0 %v1727_v9  ;;  %v3490_v25 = vpop.f32.mrb[38].mxu0 }
 0x5a3   : > { %v3492_v10 = vpop.f32.mrb[39].mxu0 }
 0x5a4   : > { %v1730_v11 = vmax.f32 %v3490_v25, %v3492_v10 }
 0x5a6   : > { %1731 = vmax.xlane.f32.xlu1 %v1730_v11  ;;  %v3496_v12 = vpop.f32.mrb[40].mxu0 }
 0x5a7   : > { %v3498_v13 = vpop.f32.mrb[41].mxu0 }
 0x5a8   : > { %v1733_v16 = vmax.f32 %v3496_v12, %v3498_v13 }
 0x5aa   : > { %1734 = vmax.xlane.f32.xlu0 %v1733_v16  ;;  %v3502_v17 = vpop.f32.mrb[42].mxu0 }
 0x5ab   : > { %v3504_v18 = vpop.f32.mrb[43].mxu0 }
 0x5ac   : > { %v1736_v19 = vmax.f32 %v3502_v17, %v3504_v18 }
 0x5ae   : > { %1737 = vmax.xlane.f32.xlu1 %v1736_v19  ;;  %v3508_v36 = vpop.f32.mrb[44].mxu0 }
 0x5af   : > { %v3510_v37 = vpop.f32.mrb[45].mxu0 }
 0x5b0   : > { %v1739_v38 = vmax.f32 %v3508_v36, %v3510_v37 }
 0x5b2   : > { %1740 = vmax.xlane.f32.xlu0 %v1739_v38  ;;  %v3514_v39 = vpop.f32.mrb[46].mxu0 }
 0x5b3   : > { %v3516_v20 = vpop.f32.mrb[47].mxu0 }
 0x5b4   : > { %v1742_v21 = vmax.f32 %v3514_v39, %v3516_v20 }
 0x5b6   : > { %1743 = vmax.xlane.f32.xlu1 %v1742_v21  ;;  %v3520_v28 = vpop.f32.mrb[48].mxu0 }
 0x5b7   : > { %v3522_v22 = vpop.f32.mrb[49].mxu0 }
 0x5b8   : > { %v1745_v23 = vmax.f32 %v3520_v28, %v3522_v22 }
 0x5ba   : > { %1746 = vmax.xlane.f32.xlu0 %v1745_v23  ;;  %v3526_v32 = vpop.f32.mrb[50].mxu0 }
 0x5bb   : > { %v3528_v35 = vpop.f32.mrb[51].mxu0 }
 0x5bc   : > { %v1748_v46 = vmax.f32 %v3526_v32, %v3528_v35 }
 0x5be   : > { %1749 = vmax.xlane.f32.xlu1 %v1748_v46  ;;  %v3532_v45 = vpop.f32.mrb[52].mxu0 }
 0x5bf   : > { %v3534_v49 = vpop.f32.mrb[53].mxu0 }
 0x5c0   : > { %v1751_v54 = vmax.f32 %v3532_v45, %v3534_v49 }
 0x5c2   : > { %1752 = vmax.xlane.f32.xlu0 %v1751_v54  ;;  %v3538_v2 = vpop.f32.mrb[54].mxu0 }
 0x5c3   : > { %v3540_v59 = vpop.f32.mrb[55].mxu0 }
 0x5c4   : > { %v1754_v7 = vmax.f32 %v3538_v2, %v3540_v59 }
 0x5c6   : > { %1755 = vmax.xlane.f32.xlu1 %v1754_v7  ;;  %v3544_v62 = vpop.f32.mrb[56].mxu0 }
 0x5c7   : > { %v3546_v15 = vpop.f32.mrb[57].mxu0 }
 0x5c8   : > { %v1757_v51 = vmax.f32 %v3544_v62, %v3546_v15 }
 0x5ca   : > { %1758 = vmax.xlane.f32.xlu0 %v1757_v51  ;;  %v3550_v57 = vpop.f32.mrb[58].mxu0 }
 0x5cb   : > { %3900 = vst [vmem:[#allocation5_spill] sm:$0xff] %v3550_v57  ;;  %v3552_v26 = vpop.f32.mrb[59].mxu0 }
 0x5cc   : > { %3901 = vst [vmem:[#allocation6_spill] sm:$0xff] %v3552_v26  ;;  %v1760_v9 = vmax.f32 %v3550_v57, %v3552_v26 }
 0x5ce   : > { %1761 = vmax.xlane.f32.xlu1 %v1760_v9  ;;  %v3556_v11 = vpop.f32.mrb[60].mxu0 }
 0x5cf   : > { %3902 = vst [vmem:[#allocation7_spill] sm:$0xff] %v3556_v11  ;;  %v3558_v16 = vpop.f32.mrb[61].mxu0 }
 0x5d0   : > { %3903 = vst [vmem:[#allocation8_spill] sm:$0xff] %v3558_v16  ;;  %v1763_v19 = vmax.f32 %v3556_v11, %v3558_v16 }
 0x5d2   : > { %1764 = vmax.xlane.f32.xlu0 %v1763_v19  ;;  %v3562_v38 = vpop.f32.mrb[62].mxu0 }
 0x5d3   : > { %3904 = vst [vmem:[#allocation9_spill] sm:$0xff] %v3562_v38  ;;  %v3564_v21 = vpop.f32.mrb[63].mxu0 }
 0x5d4   : > { %3905 = vst [vmem:[#allocation10_spill] sm:$0xff] %v3564_v21  ;;  %v1766_v23 = vmax.f32 %v3562_v38, %v3564_v21 }
 0x5d6   : > { %1767 = vmax.xlane.f32.xlu1 %v1766_v23  ;;  %v3568_v46 = vpop.f32.mrb[64].mxu0 }
 0x5d7   : > { %3906 = vst [vmem:[#allocation11_spill] sm:$0xff] %v3568_v46  ;;  %v3570_v54 = vpop.f32.mrb[65].mxu0 }
 0x5d8   : > { %3907 = vst [vmem:[#allocation12_spill] sm:$0xff] %v3570_v54  ;;  %v1769_v7 = vmax.f32 %v3568_v46, %v3570_v54 }
 0x5da   : > { %1770 = vmax.xlane.f32.xlu0 %v1769_v7  ;;  %v3574_v51 = vpop.f32.mrb[66].mxu0 }
 0x5db   : > { %3908 = vst [vmem:[#allocation13_spill] sm:$0xff] %v3574_v51  ;;  %v3576_v9 = vpop.f32.mrb[67].mxu0 }
 0x5dc   : > { %3909 = vst [vmem:[#allocation14_spill] sm:$0xff] %v3576_v9  ;;  %v1772_v19 = vmax.f32 %v3574_v51, %v3576_v9  ;;  %v862_v9 = vld [vmem:[%s3880_s5 + $0x88] sm:$0xff] }
 0x5de   : > { %1773 = vmax.xlane.f32.xlu1 %v1772_v19  ;;  %v3580_v30 = vpop.f32.mrb[68].mxu0  ;;  %v3595_v19 = vpop.f32.mrb[32].mxu1 }
 0x5df   : > { %3910 = vst [vmem:[#allocation15_spill] sm:$0xff] %v3580_v30  ;;  %v3582_v21 = vpop.f32.mrb[69].mxu0  ;;  %3912 = vst [vmem:[#allocation17_spill] sm:$0xff] %v3595_v19  ;;  %v3597_v51 = vpop.f32.mrb[33].mxu1  ;;  %v861_v19 = vld [vmem:[%s3880_s5 + $0x80] sm:$0xff] }
 0x5e0   : > { %3911 = vst [vmem:[#allocation16_spill] sm:$0xff] %v3582_v21  ;;  %v1775_v23 = vmax.f32 %v3580_v30, %v3582_v21  ;;  %3913 = vst [vmem:[#allocation18_spill] sm:$0xff] %v3597_v51  ;;  %v3599_v46 = vpop.f32.mrb[34].mxu1 }
 0x5e1   : > { %3914 = vst [vmem:[#allocation19_spill] sm:$0xff] %v3599_v46  ;;  %v3604_v21 = vpop.f32.mrb[35].mxu1  ;;  %v865_v46 = vld [vmem:[%s3880_s5 + $0xa0] sm:$0xff] }
 0x5e2   : > { %1776 = vmax.xlane.f32.xlu0 %v1775_v23  ;;  %v3586_v38 = vpop.f32.mrb[70].mxu0  ;;  %v863_v23 = vld [vmem:[%s3880_s5 + $0x90] sm:$0xff]  ;;  %3915 = vst [vmem:[#allocation20_spill] sm:$0xff] %v3604_v21  ;;  %v3606_v30 = vpop.f32.mrb[36].mxu1 }
 0x5e3   : > { %v3588_v54 = vpop.f32.mrb[71].mxu0  ;;  %3916 = vst [vmem:[#allocation21_spill] sm:$0xff] %v3606_v30  ;;  %v3608_v7 = vpop.f32.mrb[37].mxu1 }
 0x5e4   : > { %3917 = vst [vmem:[#allocation22_spill] sm:$0xff] %v3608_v7  ;;  %v3618_v21 = vpop.f32.mrb[38].mxu1 }
 0x5e5   : > { %3918 = vst [vmem:[#allocation23_spill] sm:$0xff] %v3618_v21  ;;  %v3620_v30 = vpop.f32.mrb[39].mxu1 }
 0x5e6   : > { %3919 = vst [vmem:[#allocation24_spill] sm:$0xff] %v3620_v30  ;;  %v3622_v26 = vpop.f32.mrb[40].mxu1 }
 0x5e7   : > { %3920 = vst [vmem:[#allocation25_spill] sm:$0xff] %v3622_v26 }
 0x5ef   : > { %957 = vperm.xlu1 %2602, %v862_v9  }
 0x5f3   : > { %962 = vperm.xlu1 %2602, %v863_v23  }
 0x5f7   : > { %v1687_v16 = vpop.xlane.xlu0 %1686 }
 0x5f8   : > { %v1781_v9 = vsub.f32 %v3400_v29, %v1687_v16  ;;  %v1782_v51 = vsub.f32 %v3402_v31, %v1687_v16  ;;  %952 = vperm.xlu0 %2601, %v861_v19   ;;  %v3626_v31 = vpop.f32.mrb[41].mxu1  ;;  %v867_v16 = vld [vmem:[%s3880_s5 + $0xb0] sm:$0xff] }
 0x5f9   : > { %v3631_v19 = vpop.f32.mrb[42].mxu1 }
 0x5fa   : > { %v1845_v23 = vmul.f32 1.442695, %v1781_v9  ;;  %v1847_v7 = vmul.f32 1.442695, %v1782_v51  ;;  %v3633_v51 = vpop.f32.mrb[43].mxu1 }
 0x5fb   : > { %v1690_v11 = vpop.xlane.xlu1 %1689  ;;  %v3635_v21 = vpop.f32.mrb[44].mxu1 }
 0x5fc   : > { %v1783_v57 = vsub.f32 %v3406_v33, %v1690_v11  ;;  %v1784_v29 = vsub.f32 %v3408_v34, %v1690_v11  ;;  %972 = vperm.xlu0 %2601, %v865_v46   ;;  %2636 = vpow2.f32 %v1845_v23  ;;  %3921 = vst [vmem:[#allocation26_spill] sm:$0xff] %v3635_v21  ;;  %v3639_v11 = vpop.f32.mrb[45].mxu1 }
 0x5fd   : > { %2638 = vpow2.f32 %v1847_v7  ;;  %3922 = vst [vmem:[#allocation27_spill] sm:$0xff] %v3639_v11  ;;  %v3644_v46 = vpop.f32.mrb[46].mxu1 }
 0x5fe   : > { %v1849_v9 = vmul.f32 1.442695, %v1783_v57  ;;  %v1851_v30 = vmul.f32 1.442695, %v1784_v29  ;;  %v869_v57 = vld [vmem:[%s3880_s5 + $0xc0] sm:$0x1] }
 0x5ff   : > { %v1693_v26 = vpop.xlane.xlu0 %1692  ;;  %3923 = vst [vmem:[#allocation28_spill] sm:$0xff] %v3644_v46  ;;  %v3646_v7 = vpop.f32.mrb[47].mxu1 }
 0x600   : > { %2640 = vpow2.f32 %v1849_v9  ;;  %v1785_v33 = vsub.f32 %v3412_v40, %v1693_v26  ;;  %v1786_v34 = vsub.f32 %v3414_v41, %v1693_v26  ;;  %982 = vperm.xlu0 %2601, %v867_v16   ;;  %3924 = vst [vmem:[#allocation29_spill] sm:$0xff] %v3646_v7  ;;  %v3648_v9 = vpop.f32.mrb[48].mxu1 }
 0x601   : > { %2642 = vpow2.f32 %v1851_v30  ;;  %3925 = vst [vmem:[#allocation30_spill] sm:$0xff] %v3648_v9  ;;  %v3652_v26 = vpop.f32.mrb[49].mxu1  ;;  %v2129_v30 = vld [vmem:[%s3882_s7 + $0x8] sm:$0xff] }
 0x602   : > { %v1853_v23 = vmul.f32 1.442695, %v1785_v33  ;;  %v1855_v29 = vmul.f32 1.442695, %v1786_v34  ;;  %v1255_v16 = vpop.f32.mrb[50].mxu1 }
 0x603   : > { %v1696_v21 = vpop.xlane.xlu0 %1695  ;;  %v1256_v7 = vpop.f32.mrb[51].mxu1 }
 0x604   : > { %v1787_v40 = vsub.f32 %v3418_v42, %v1696_v21  ;;  %v1788_v41 = vsub.f32 %v3420_v43, %v1696_v21  ;;  %992 = vperm.xlu0 %2601, %v869_v57   ;;  %2644 = vpow2.f32 %v1853_v23  ;;  %v2131_v57 = vld [vmem:[%s3882_s7 + $0x18] sm:$0xff] }
 0x605   : > { %2646 = vpow2.f32 %v1855_v29 }
 0x606   : > { %v1857_v33 = vmul.f32 1.442695, %v1787_v40  ;;  %v1859_v46 = vmul.f32 1.442695, %v1788_v41  ;;  %v2637_v11 = vpop.eup %2636 }
 0x607   : > { %v1699_v34 = vpop.xlane.xlu0 %1698  ;;  %v2639_v21 = vpop.eup %2638 }
 0x608   : > { %2648 = vpow2.f32 %v1857_v33  ;;  %v1789_v42 = vsub.f32 %v3424_v47, %v1699_v34  ;;  %v1790_v43 = vsub.f32 %v3426_v44, %v1699_v34  ;;  %2143 = vperm.xlu0 %2601, %v2129_v30   ;;  %v2133_v44 = vld [vmem:[%s3882_s7 + $0x28] sm:$0xff] }
 0x609   : > { %2650 = vpow2.f32 %v1859_v46 }
 0x60a   : > { %v2641_v16 = vpop.eup %2640  ;;  %v1861_v23 = vmul.f32 1.442695, %v1789_v42  ;;  %v1863_v41 = vmul.f32 1.442695, %v1790_v43  ;;  %v2135_v43 = vld [vmem:[%s3882_s7 + $0x38] sm:$0xff] }
 0x60b   : > { %v2643_v40 = vpop.eup %2642  ;;  %v1702_v7 = vpop.xlane.xlu1 %1701  ;;  %v1973_v29 = vpack.c.bf16 %v2641_v16, %v2637_v11 }
 0x60c   : > { %v1791_v9 = vsub.f32 %v3430_v52, %v1702_v7  ;;  %v1792_v33 = vsub.f32 %v3432_v50, %v1702_v7  ;;  %2153 = vperm.xlu0 %2601, %v2131_v57   ;;  %v1974_v47 = vpack.c.bf16 %v2643_v40, %v2639_v21  ;;  %2652 = vpow2.f32 %v1861_v23 }
 0x60d   : > { %2654 = vpow2.f32 %v1863_v41 }
 0x60e   : > { %v1865_v46 = vmul.f32 1.442695, %v1791_v9  ;;  %v1867_v30 = vmul.f32 1.442695, %v1792_v33  ;;  %2005 = vmatprep.subr.bf16.mxu1 %v1974_v47  ;;  %v2645_v42 = vpop.eup %2644  ;;  %v3926_v33 = vmax.f32 %v3586_v38, %v3588_v54 }
 0x60f   : > { %2006 = vmatpush1.bf16.xpose.msra.mxu1 %v1973_v29  ;;  %v1705_v34 = vpop.xlane.xlu0 %1704  ;;  %v2647_v50 = vpop.eup %2646 }
 0x610   : > { %2656 = vpow2.f32 %v1865_v46  ;;  %v1793_v11 = vsub.f32 %v3436_v55, %v1705_v34  ;;  %v1794_v52 = vsub.f32 %v3438_v48, %v1705_v34  ;;  %2163 = vperm.xlu0 %2601, %v2133_v44  }
 0x611   : > { %2658 = vpow2.f32 %v1867_v30 }
 0x612   : > { %v2649_v21 = vpop.eup %2648  ;;  %v1869_v9 = vmul.f32 1.442695, %v1793_v11  ;;  %v1871_v16 = vmul.f32 1.442695, %v1794_v52 }
 0x613   : > { %v2651_v57 = vpop.eup %2650  ;;  %v1708_v23 = vpop.xlane.xlu1 %1707  ;;  %v1975_v40 = vpack.c.bf16 %v2649_v21, %v2645_v42 }
 0x614   : > { %v1795_v41 = vsub.f32 %v3442_v58, %v1708_v23  ;;  %v1796_v7 = vsub.f32 %v3444_v4, %v1708_v23  ;;  %2173 = vperm.xlu0 %2601, %v2135_v43   ;;  %v1976_v55 = vpack.c.bf16 %v2651_v57, %v2647_v50  ;;  %2660 = vpow2.f32 %v1869_v9 }
 0x615   : > { %2662 = vpow2.f32 %v1871_v16 }
 0x616   : > { %v1873_v48 = vmul.f32 1.442695, %v1795_v41  ;;  %v1875_v29 = vmul.f32 1.442695, %v1796_v7  ;;  %2007 = vmatprep.subr.bf16.mxu1 %v1976_v55  ;;  %v2653_v44 = vpop.eup %2652 }
 0x617   : > { %2008 = vmatpush1.bf16.xpose.msra.mxu1 %v1975_v40  ;;  %1779 = vmax.xlane.f32.xlu1 %v3926_v33  ;;  %v1711_v47 = vpop.xlane.xlu0 %1710  ;;  %v2655_v4 = vpop.eup %2654 }
 0x618   : > { %2664 = vpow2.f32 %v1873_v48  ;;  %v1797_v46 = vsub.f32 %v3448_v6, %v1711_v47  ;;  %v1798_v58 = vsub.f32 %v3450_v60, %v1711_v47 }
 0x619   : > { %2666 = vpow2.f32 %v1875_v29 }
 0x61a   : > { %v2657_v30 = vpop.eup %2656  ;;  %v1877_v34 = vmul.f32 1.442695, %v1797_v46  ;;  %v1879_v11 = vmul.f32 1.442695, %v1798_v58  ;;  %v864_v46 = vld [vmem:[%s3880_s5 + $0x98] sm:$0xff] }
 0x61b   : > { %v2659_v42 = vpop.eup %2658  ;;  %v1714_v52 = vpop.xlane.xlu1 %1713  ;;  %v1977_v50 = vpack.c.bf16 %v2657_v30, %v2653_v44 }
 0x61c   : > { %v1799_v43 = vsub.f32 %v3454_v61, %v1714_v52  ;;  %v1800_v21 = vsub.f32 %v3456_v53, %v1714_v52  ;;  %v1978_v9 = vpack.c.bf16 %v2659_v42, %v2655_v4  ;;  %2668 = vpow2.f32 %v1877_v34  ;;  %v866_v34 = vld [vmem:[%s3880_s5 + $0xa8] sm:$0xff] }
 0x61d   : > { %2670 = vpow2.f32 %v1879_v11 }
 0x61e   : > { %v1881_v57 = vmul.f32 1.442695, %v1799_v43  ;;  %v1883_v16 = vmul.f32 1.442695, %v1800_v21  ;;  %2009 = vmatprep.subr.bf16.mxu1 %v1978_v9  ;;  %v2661_v60 = vpop.eup %2660 }
 0x61f   : > { %2010 = vmatpush1.bf16.xpose.msra.mxu1 %v1977_v50  ;;  %v1717_v6 = vpop.xlane.xlu0 %1716  ;;  %v2663_v41 = vpop.eup %2662 }
 0x620   : > { %2672 = vpow2.f32 %v1881_v57  ;;  %v1801_v23 = vsub.f32 %v3460_v14, %v1717_v6  ;;  %v1802_v40 = vsub.f32 %v3462_v0, %v1717_v6 }
 0x621   : > { %2674 = vpow2.f32 %v1883_v16 }
 0x622   : > { %v2665_v7 = vpop.eup %2664  ;;  %v1885_v61 = vmul.f32 1.442695, %v1801_v23  ;;  %v1887_v53 = vmul.f32 1.442695, %v1802_v40 }
 0x623   : > { %v2667_v55 = vpop.eup %2666  ;;  %v1720_v48 = vpop.xlane.xlu1 %1719  ;;  %v1979_v29 = vpack.c.bf16 %v2665_v7, %v2661_v60 }
 0x624   : > { %v1803_v33 = vsub.f32 %v3466_v1, %v1720_v48  ;;  %v1804_v47 = vsub.f32 %v3468_v63, %v1720_v48  ;;  %v1980_v44 = vpack.c.bf16 %v2667_v55, %v2663_v41  ;;  %2676 = vpow2.f32 %v1885_v61  ;;  %v2128_v41 = vld [vmem:[%s3882_s7] sm:$0xff] }
 0x625   : > { %2678 = vpow2.f32 %v1887_v53 }
 0x626   : > { %v1889_v14 = vmul.f32 1.442695, %v1803_v33  ;;  %v1891_v0 = vmul.f32 1.442695, %v1804_v47  ;;  %2011 = vmatprep.subr.bf16.mxu1 %v1980_v44  ;;  %v2669_v4 = vpop.eup %2668 }
 0x627   : > { %2012 = vmatpush1.bf16.xpose.msra.mxu1 %v1979_v29  ;;  %v1723_v58 = vpop.xlane.xlu0 %1722  ;;  %v2671_v63 = vpop.eup %2670 }
 0x628   : > { %2680 = vpow2.f32 %v1889_v14  ;;  %v1805_v30 = vsub.f32 %v3472_v3, %v1723_v58  ;;  %v1806_v1 = vsub.f32 %v3474_v5, %v1723_v58  ;;  %967 = vperm.xlu1 %2602, %v864_v46   ;;  %v868_v5 = vld [vmem:[%s3880_s5 + $0xb8] sm:$0xff] }
 0x629   : > { %2682 = vpow2.f32 %v1891_v0 }
 0x62a   : > { %v2673_v42 = vpop.eup %2672  ;;  %v1893_v11 = vmul.f32 1.442695, %v1805_v30  ;;  %v1895_v50 = vmul.f32 1.442695, %v1806_v1 }
 0x62b   : > { %v2675_v52 = vpop.eup %2674  ;;  %v1726_v43 = vpop.xlane.xlu1 %1725  ;;  %v1981_v21 = vpack.c.bf16 %v2673_v42, %v2669_v4  ;;  %v2132_v4 = vld [vmem:[%s3882_s7 + $0x20] sm:$0xff] }
 0x62c   : > { %v1807_v9 = vsub.f32 %v3478_v56, %v1726_v43  ;;  %v1808_v57 = vsub.f32 %v3480_v8, %v1726_v43  ;;  %977 = vperm.xlu1 %2602, %v866_v34   ;;  %v1982_v3 = vpack.c.bf16 %v2675_v52, %v2671_v63  ;;  %2684 = vpow2.f32 %v1893_v11 }
 0x62d   : > { %2686 = vpow2.f32 %v1895_v50 }
 0x62e   : > { %v1897_v16 = vmul.f32 1.442695, %v1807_v9  ;;  %v1899_v6 = vmul.f32 1.442695, %v1808_v57  ;;  %2013 = vmatprep.subr.bf16.mxu1 %v1982_v3  ;;  %v2677_v23 = vpop.eup %2676 }
 0x62f   : > { %2014 = vmatpush1.bf16.xpose.msra.mxu1 %v1981_v21  ;;  %v1729_v60 = vpop.xlane.xlu0 %1728  ;;  %v2679_v8 = vpop.eup %2678 }
 0x630   : > { %2688 = vpow2.f32 %v1897_v16  ;;  %v1809_v40 = vsub.f32 %v3484_v27, %v1729_v60  ;;  %v1810_v56 = vsub.f32 %v3486_v24, %v1729_v60  ;;  %987 = vperm.xlu1 %2602, %v868_v5   ;;  %v2130_v24 = vld [vmem:[%s3882_s7 + $0x10] sm:$0xff] }
 0x631   : > { %2690 = vpow2.f32 %v1899_v6 }
 0x632   : > { %v2681_v7 = vpop.eup %2680  ;;  %v1901_v61 = vmul.f32 1.442695, %v1809_v40  ;;  %v1903_v53 = vmul.f32 1.442695, %v1810_v56 }
 0x633   : > { %v2683_v55 = vpop.eup %2682  ;;  %v1732_v48 = vpop.xlane.xlu1 %1731  ;;  %v1983_v29 = vpack.c.bf16 %v2681_v7, %v2677_v23 }
 0x634   : > { %v1811_v33 = vsub.f32 %v3490_v25, %v1732_v48  ;;  %v1812_v47 = vsub.f32 %v3492_v10, %v1732_v48  ;;  %2138 = vperm.xlu1 %2602, %v2128_v41   ;;  %v1984_v27 = vpack.c.bf16 %v2683_v55, %v2679_v8  ;;  %2692 = vpow2.f32 %v1901_v61 }
 0x635   : > { %2694 = vpow2.f32 %v1903_v53 }
 0x636   : > { %v1905_v44 = vmul.f32 1.442695, %v1811_v33  ;;  %v1907_v46 = vmul.f32 1.442695, %v1812_v47  ;;  %2015 = vmatprep.subr.bf16.mxu1 %v1984_v27  ;;  %v2685_v0 = vpop.eup %2684 }
 0x637   : > { %2016 = vmatpush1.bf16.xpose.msra.mxu1 %v1983_v29  ;;  %v1735_v14 = vpop.xlane.xlu0 %1734  ;;  %v2687_v10 = vpop.eup %2686 }
 0x638   : > { %2696 = vpow2.f32 %v1905_v44  ;;  %v1813_v58 = vsub.f32 %v3496_v12, %v1735_v14  ;;  %v1814_v25 = vsub.f32 %v3498_v13, %v1735_v14  ;;  %2148 = vperm.xlu1 %2602, %v2130_v24   ;;  %v2134_v13 = vld [vmem:[%s3882_s7 + $0x30] sm:$0xff] }
 0x639   : > { %2698 = vpow2.f32 %v1907_v46 }
 0x63a   : > { %v2689_v30 = vpop.eup %2688  ;;  %v1909_v1 = vmul.f32 1.442695, %v1813_v58  ;;  %v1911_v34 = vmul.f32 1.442695, %v1814_v25 }
 0x63b   : > { %v2691_v63 = vpop.eup %2690  ;;  %v1738_v42 = vpop.xlane.xlu1 %1737  ;;  %v1985_v11 = vpack.c.bf16 %v2689_v30, %v2685_v0 }
 0x63c   : > { %v1815_v52 = vsub.f32 %v3502_v17, %v1738_v42  ;;  %v1816_v50 = vsub.f32 %v3504_v18, %v1738_v42  ;;  %2158 = vperm.xlu1 %2602, %v2132_v4   ;;  %v1986_v12 = vpack.c.bf16 %v2691_v63, %v2687_v10  ;;  %2700 = vpow2.f32 %v1909_v1 }
 0x63d   : > { %2702 = vpow2.f32 %v1911_v34 }
 0x63e   : > { %v1913_v43 = vmul.f32 1.442695, %v1815_v52  ;;  %v1915_v21 = vmul.f32 1.442695, %v1816_v50  ;;  %2017 = vmatprep.subr.bf16.mxu1 %v1986_v12  ;;  %v2693_v57 = vpop.eup %2692 }
 0x63f   : > { %2018 = vmatpush1.bf16.xpose.msra.mxu1 %v1985_v11  ;;  %v1741_v9 = vpop.xlane.xlu0 %1740  ;;  %v2695_v18 = vpop.eup %2694 }
 0x640   : > { %2704 = vpow2.f32 %v1913_v43  ;;  %v1817_v3 = vsub.f32 %v3508_v36, %v1741_v9  ;;  %v1818_v17 = vsub.f32 %v3510_v37, %v1741_v9  ;;  %2168 = vperm.xlu1 %2602, %v2134_v13  }
 0x641   : > { %2706 = vpow2.f32 %v1915_v21 }
 0x642   : > { %v2697_v5 = vpop.eup %2696  ;;  %v1917_v16 = vmul.f32 1.442695, %v1817_v3  ;;  %v1919_v60 = vmul.f32 1.442695, %v1818_v17  ;;  %v3927_v17 = vld [vmem:[#allocation5_spill] sm:$0xff] }
 0x643   : > { %v2699_v6 = vpop.eup %2698  ;;  %v1744_v23 = vpop.xlane.xlu1 %1743  ;;  %v1987_v40 = vpack.c.bf16 %v2697_v5, %v2693_v57  ;;  %v3928_v5 = vld [vmem:[#allocation6_spill] sm:$0xff] }
 0x644   : > { %v1819_v56 = vsub.f32 %v3514_v39, %v1744_v23  ;;  %v1820_v8 = vsub.f32 %v3516_v20, %v1744_v23  ;;  %v1988_v41 = vpack.c.bf16 %v2699_v6, %v2695_v18  ;;  %2708 = vpow2.f32 %v1917_v16 }
 0x645   : > { %2710 = vpow2.f32 %v1919_v60 }
 0x646   : > { %v1921_v7 = vmul.f32 1.442695, %v1819_v56  ;;  %v1923_v61 = vmul.f32 1.442695, %v1820_v8  ;;  %2019 = vmatprep.subr.bf16.mxu1 %v1988_v41  ;;  %v2701_v37 = vpop.eup %2700  ;;  %v3930_v8 = vld [vmem:[#allocation8_spill] sm:$0xff] }
 0x647   : > { %2020 = vmatpush1.bf16.xpose.msra.mxu1 %v1987_v40  ;;  %v1747_v36 = vpop.xlane.xlu0 %1746  ;;  %v2703_v48 = vpop.eup %2702  ;;  %v3929_v40 = vld [vmem:[#allocation7_spill] sm:$0xff] }
 0x648   : > { %2712 = vpow2.f32 %v1921_v7  ;;  %v1821_v55 = vsub.f32 %v3520_v28, %v1747_v36  ;;  %v1822_v53 = vsub.f32 %v3522_v22, %v1747_v36 }
 0x649   : > { %2714 = vpow2.f32 %v1923_v61 }
 0x64a   : > { %v2705_v29 = vpop.eup %2704  ;;  %v1925_v39 = vmul.f32 1.442695, %v1821_v55  ;;  %v1927_v20 = vmul.f32 1.442695, %v1822_v53 }
 0x64b   : > { %v2707_v33 = vpop.eup %2706  ;;  %v1750_v47 = vpop.xlane.xlu1 %1749  ;;  %v1989_v27 = vpack.c.bf16 %v2705_v29, %v2701_v37  ;;  %v3931_v29 = vld [vmem:[#allocation9_spill] sm:$0xff] }
 0x64c   : > { %v1823_v24 = vsub.f32 %v3526_v32, %v1750_v47  ;;  %v1824_v44 = vsub.f32 %v3528_v35, %v1750_v47  ;;  %v1990_v46 = vpack.c.bf16 %v2707_v33, %v2703_v48  ;;  %2716 = vpow2.f32 %v1925_v39  ;;  %v3932_v33 = vld [vmem:[#allocation10_spill] sm:$0xff] }
 0x64d   : > { %2718 = vpow2.f32 %v1927_v20 }
 0x64e   : > { %v1929_v14 = vmul.f32 1.442695, %v1823_v24  ;;  %v1931_v0 = vmul.f32 1.442695, %v1824_v44  ;;  %2021 = vmatprep.subr.bf16.mxu1 %v1990_v46  ;;  %v2709_v22 = vpop.eup %2708 }
 0x64f   : > { %2022 = vmatpush1.bf16.xpose.msra.mxu1 %v1989_v27  ;;  %v1753_v28 = vpop.xlane.xlu0 %1752  ;;  %v2711_v10 = vpop.eup %2710 }
 0x650   : > { %2720 = vpow2.f32 %v1929_v14  ;;  %v1825_v58 = vsub.f32 %v3532_v45, %v1753_v28  ;;  %v1826_v25 = vsub.f32 %v3534_v49, %v1753_v28  ;;  %v3933_v14 = vld [vmem:[#allocation11_spill] sm:$0xff]  ;;  %v3934_v28 = vld [vmem:[#allocation12_spill] sm:$0xff] }
 0x651   : > { %2722 = vpow2.f32 %v1931_v0 }
 0x652   : > { %v2713_v4 = vpop.eup %2712  ;;  %v1933_v32 = vmul.f32 1.442695, %v1825_v58  ;;  %v1935_v35 = vmul.f32 1.442695, %v1826_v25 }
 0x653   : > { %v2715_v30 = vpop.eup %2714  ;;  %v1756_v1 = vpop.xlane.xlu1 %1755  ;;  %v1991_v63 = vpack.c.bf16 %v2713_v4, %v2709_v22 }
 0x654   : > { %v1827_v34 = vsub.f32 %v3538_v2, %v1756_v1  ;;  %v1828_v42 = vsub.f32 %v3540_v59, %v1756_v1  ;;  %v1992_v11 = vpack.c.bf16 %v2715_v30, %v2711_v10  ;;  %2724 = vpow2.f32 %v1933_v32  ;;  %v3935_v1 = vld [vmem:[#allocation13_spill] sm:$0xff] }
 0x655   : > { %2726 = vpow2.f32 %v1935_v35 }
 0x656   : > { %v1937_v52 = vmul.f32 1.442695, %v1827_v34  ;;  %v1939_v50 = vmul.f32 1.442695, %v1828_v42  ;;  %2023 = vmatprep.subr.bf16.mxu1 %v1992_v11  ;;  %v2717_v49 = vpop.eup %2716  ;;  %v3936_v34 = vld [vmem:[#allocation14_spill] sm:$0xff] }
 0x657   : > { %2024 = vmatpush1.bf16.xpose.msra.mxu1 %v1991_v63  ;;  %v1759_v45 = vpop.xlane.xlu0 %1758  ;;  %v2719_v43 = vpop.eup %2718 }
 0x658   : > { %2728 = vpow2.f32 %v1937_v52  ;;  %v1829_v12 = vsub.f32 %v3544_v62, %v1759_v45  ;;  %v1830_v13 = vsub.f32 %v3546_v15, %v1759_v45 }
 0x659   : > { %2730 = vpow2.f32 %v1939_v50 }
 0x65a   : > { %v2721_v21 = vpop.eup %2720  ;;  %v1941_v2 = vmul.f32 1.442695, %v1829_v12  ;;  %v1943_v59 = vmul.f32 1.442695, %v1830_v13  ;;  %v3937_v12 = vld [vmem:[#allocation19_spill] sm:$0xff] }
 0x65b   : > { %v2723_v9 = vpop.eup %2722  ;;  %v1762_v57 = vpop.xlane.xlu1 %1761  ;;  %v1993_v3 = vpack.c.bf16 %v2721_v21, %v2717_v49 }
 0x65c   : > { %v1831_v18 = vsub.f32 %v3927_v17, %v1762_v57  ;;  %v1832_v16 = vsub.f32 %v3928_v5, %v1762_v57  ;;  %v1994_v6 = vpack.c.bf16 %v2723_v9, %v2719_v43  ;;  %2732 = vpow2.f32 %v1941_v2 }
 0x65d   : > { %2734 = vpow2.f32 %v1943_v59 }
 0x65e   : > { %v1945_v60 = vmul.f32 1.442695, %v1831_v18  ;;  %v1947_v23 = vmul.f32 1.442695, %v1832_v16  ;;  %2025 = vmatprep.subr.bf16.mxu1 %v1994_v6  ;;  %v2725_v15 = vpop.eup %2724  ;;  %v3938_v18 = vld [vmem:[#allocation20_spill] sm:$0xff]  ;;  %v3939_v16 = vld [vmem:[#allocation17_spill] sm:$0xff] }
 0x65f   : > { %2026 = vmatpush1.bf16.xpose.msra.mxu1 %v1993_v3  ;;  %v1765_v62 = vpop.xlane.xlu0 %1764  ;;  %v2727_v7 = vpop.eup %2726 }
 0x660   : > { %2736 = vpow2.f32 %v1945_v60  ;;  %v1833_v56 = vsub.f32 %v3929_v40, %v1765_v62  ;;  %v1834_v41 = vsub.f32 %v3930_v8, %v1765_v62  ;;  %v3940_v60 = vld [vmem:[#allocation18_spill] sm:$0xff] }
 0x661   : > { %2738 = vpow2.f32 %v1947_v23 }
 0x662   : > { %v2729_v61 = vpop.eup %2728  ;;  %v1949_v36 = vmul.f32 1.442695, %v1833_v56  ;;  %v1951_v55 = vmul.f32 1.442695, %v1834_v41 }
 0x663   : > { %v2731_v37 = vpop.eup %2730  ;;  %v1768_v53 = vpop.xlane.xlu1 %1767  ;;  %v1995_v48 = vpack.c.bf16 %v2729_v61, %v2725_v15  ;;  %v3941_v61 = vld [vmem:[#allocation15_spill] sm:$0xff] }
 0x664   : > { %v1835_v39 = vsub.f32 %v3931_v29, %v1768_v53  ;;  %v1836_v20 = vsub.f32 %v3932_v33, %v1768_v53  ;;  %v1996_v47 = vpack.c.bf16 %v2731_v37, %v2727_v7  ;;  %2740 = vpow2.f32 %v1949_v36  ;;  %v3942_v37 = vld [vmem:[#allocation16_spill] sm:$0xff] }
 0x665   : > { %2742 = vpow2.f32 %v1951_v55 }
 0x666   : > { %v1953_v27 = vmul.f32 1.442695, %v1835_v39  ;;  %v1955_v24 = vmul.f32 1.442695, %v1836_v20  ;;  %2027 = vmatprep.subr.bf16.mxu1 %v1996_v47  ;;  %v2733_v46 = vpop.eup %2732 }
 0x667   : > { %2028 = vmatpush1.bf16.xpose.msra.mxu1 %v1995_v48  ;;  %v1771_v44 = vpop.xlane.xlu0 %1770  ;;  %v2735_v58 = vpop.eup %2734 }
 0x668   : > { %2744 = vpow2.f32 %v1953_v27  ;;  %v1837_v0 = vsub.f32 %v3933_v14, %v1771_v44  ;;  %v1838_v22 = vsub.f32 %v3934_v28, %v1771_v44 }
 0x669   : > { %2746 = vpow2.f32 %v1955_v24  ;;  %v3943_v24 = vld [vmem:[#allocation21_spill] sm:$0xff] }
 0x66a   : > { %v2737_v25 = vpop.eup %2736  ;;  %v1957_v10 = vmul.f32 1.442695, %v1837_v0  ;;  %v1959_v32 = vmul.f32 1.442695, %v1838_v22  ;;  %v3944_v0 = vld [vmem:[#allocation22_spill] sm:$0xff]  ;;  %v3945_v22 = vld [vmem:[#allocation23_spill] sm:$0xff] }
 0x66b   : > { %v2739_v4 = vpop.eup %2738  ;;  %v1774_v30 = vpop.xlane.xlu1 %1773  ;;  %v1997_v35 = vpack.c.bf16 %v2737_v25, %v2733_v46  ;;  %v3946_v25 = vld [vmem:[#allocation24_spill] sm:$0xff] }
 0x66c   : > { %v1839_v63 = vsub.f32 %v3935_v1, %v1774_v30  ;;  %v1840_v42 = vsub.f32 %v3936_v34, %v1774_v30  ;;  %v1998_v11 = vpack.c.bf16 %v2739_v4, %v2735_v58  ;;  %2748 = vpow2.f32 %v1957_v10 }
 0x66d   : > { %2750 = vpow2.f32 %v1959_v32 }
 0x66e   : > { %v1961_v52 = vmul.f32 1.442695, %v1839_v63  ;;  %v1963_v50 = vmul.f32 1.442695, %v1840_v42  ;;  %2029 = vmatprep.subr.bf16.mxu1 %v1998_v11  ;;  %v2741_v49 = vpop.eup %2740 }
 0x66f   : > { %2030 = vmatpush1.bf16.xpose.msra.mxu1 %v1997_v35  ;;  %v958_v45 = vpop.permute.xlu1 %957  ;;  %v2743_v43 = vpop.eup %2742 }
 0x670   : > { %2752 = vpow2.f32 %v1961_v52  ;;  %v3743_v13 = vadd.f32 %v3937_v12, %v958_v45  ;;  %v1777_v9 = vpop.xlane.xlu0 %1776  ;;  %v1218_v5 = vadd.f32 %v3938_v18, %v958_v45  ;;  %v3948_v45 = vld [vmem:[#allocation26_spill] sm:$0xff]  ;;  %v3949_v12 = vld [vmem:[#allocation27_spill] sm:$0xff] }
 0x671   : > { %2754 = vpow2.f32 %v1963_v50  ;;  %v1841_v36 = vsub.f32 %v3941_v61, %v1777_v9  ;;  %v1842_v55 = vsub.f32 %v3942_v37, %v1777_v9 }
 0x672   : > { %v2745_v21 = vpop.eup %2744 }
 0x673   : > { %v2747_v2 = vpop.eup %2746  ;;  %v1999_v59 = vpack.c.bf16 %v2745_v21, %v2741_v49  ;;  %v963_v53 = vpop.permute.xlu1 %962  ;;  %v1965_v48 = vmul.f32 1.442695, %v1841_v36  ;;  %v1967_v29 = vmul.f32 1.442695, %v1842_v55 }
 0x674   : > { %v2000_v57 = vpack.c.bf16 %v2747_v2, %v2743_v43  ;;  %v1222_v44 = vadd.f32 %v3943_v24, %v963_v53  ;;  %v1224_v28 = vadd.f32 %v3944_v0, %v963_v53  ;;  %v3950_v43 = vld [vmem:[#allocation28_spill] sm:$0xff]  ;;  %v3951_v2 = vld [vmem:[#allocation29_spill] sm:$0xff] }
 0x675   : > { %2756 = vpow2.f32 %v1965_v48 }
 0x676   : > { %2031 = vmatprep.subr.bf16.mxu1 %v2000_v57  ;;  %v2749_v17 = vpop.eup %2748  ;;  %2758 = vpow2.f32 %v1967_v29 }
 0x677   : > { %2032 = vmatpush1.bf16.xpose.msra.mxu1 %v1999_v59  ;;  %v953_v3 = vpop.permute.xlu0 %952  ;;  %v2751_v62 = vpop.eup %2750 }
 0x678   : > { %v1212_v6 = vadd.f32 %v3939_v16, %v953_v3  ;;  %v1214_v23 = vadd.f32 %v3940_v60, %v953_v3 }
 0x67a   : > { %v2753_v15 = vpop.eup %2752  ;;  %v1258_v40 = vpack.c.bf16 %v3743_v13, %v1212_v6  ;;  %v1259_v56 = vpack.c.bf16 %v1218_v5, %v1214_v23  ;;  %v3952_v6 = vld [vmem:[#allocation30_spill] sm:$0xff] }
 0x67b   : > { %v2755_v8 = vpop.eup %2754  ;;  %v2001_v41 = vpack.c.bf16 %v2753_v15, %v2749_v17  ;;  %v973_v46 = vpop.permute.xlu0 %972 }
 0x67c   : > { %2037 = vmatprep.mubr.bf16.mxu1 %v1259_v56  ;;  %v2002_v7 = vpack.c.bf16 %v2755_v8, %v2751_v62  ;;  %v1234_v35 = vadd.f32 %v3626_v31, %v973_v46 }
 0x67e   : > { %2033 = vmatprep.subr.bf16.mxu1 %v2002_v7 }
 0x67f   : > { %2034 = vmatpush1.bf16.xpose.msra.mxu1 %v2001_v41  ;;  %v983_v34 = vpop.permute.xlu0 %982  ;;  %v2757_v50 = vpop.eup %2756 }
 0x680   : > { %v1242_v49 = vadd.f32 %v3948_v45, %v983_v34  ;;  %v1244_v13 = vadd.f32 %v3949_v12, %v983_v34  ;;  %v2759_v59 = vpop.eup %2758 }
 0x683   : > { %v993_v18 = vpop.permute.xlu0 %992 }
 0x684   : > { %v1254_v5 = vadd.f32 %v3652_v26, %v993_v18  ;;  %v1252_v60 = vadd.f32 %v3952_v6, %v993_v18 }
 0x686   : > { %v1267_v16 = vpack.c.bf16 %v1254_v5, %v1254_v5  ;;  %v1266_v23 = vpack.c.bf16 %v1252_v60, %v1252_v60 }
 0x6a4   : > { %v1780_v39 = vpop.xlane.xlu1 %1779 }
 0x6a5   : > { %v1843_v33 = vsub.f32 %v3586_v38, %v1780_v39  ;;  %v1844_v20 = vsub.f32 %v3588_v54, %v1780_v39  ;;  %v3947_v54 = vld [vmem:[#allocation25_spill] sm:$0xff] }
 0x6a6   : > { %v1232_v30 = vadd.f32 %v3947_v54, %v973_v46 }
 0x6a7   : > { %v1969_v47 = vmul.f32 1.442695, %v1843_v33  ;;  %v1971_v27 = vmul.f32 1.442695, %v1844_v20  ;;  %v2088_v20 = vlaneseq }
 0x6a8   : > { %v968_v14 = vpop.permute.xlu1 %967 }
 0x6a9   : > { %2760 = vpow2.f32 %v1969_v47  ;;  %v1226_v58 = vadd.f32 %v3945_v22, %v968_v14  ;;  %v1228_v10 = vadd.f32 %v3946_v25, %v968_v14 }
 0x6aa   : > { %2762 = vpow2.f32 %v1971_v27 }
 0x6ab   : > { %v1260_v4 = vpack.c.bf16 %v1226_v58, %v1222_v44  ;;  %v1261_v38 = vpack.c.bf16 %v1228_v10, %v1224_v28  ;;  %v2089_v44 = vshrl.u32 %v2088_v20, 7  ;;  %v2772_v20 = vld [vmem:[%s2954_s21 + $0x20] sm:$0xff] }
 0x6ac   : > { %v978_v32 = vpop.permute.xlu1 %977 }
 0x6ad   : > { %v1236_v1 = vadd.f32 %v3631_v19, %v978_v32  ;;  %v1238_v63 = vadd.f32 %v3633_v51, %v978_v32  ;;  %v2090_v46 = vsub.s32 0, %v2089_v44  ;;  %v2773_v44 = vld [vmem:[%s2954_s21 + $0x28] sm:$0xff] }
 0x6af   : > { %v1262_v42 = vpack.c.bf16 %v1236_v1, %v1232_v30  ;;  %v1263_v11 = vpack.c.bf16 %v1238_v63, %v1234_v35 }
 0x6b0   : > { %v988_v52 = vpop.permute.xlu1 %987 }
 0x6b1   : > { %v1246_v21 = vadd.f32 %v3950_v43, %v988_v52  ;;  %v1248_v9 = vadd.f32 %v3951_v2, %v988_v52 }
 0x6b3   : > { %v2761_v57 = vpop.eup %2760  ;;  %v1264_v31 = vpack.c.bf16 %v1246_v21, %v1242_v49  ;;  %v1265_v3 = vpack.c.bf16 %v1248_v9, %v1244_v13 }
 0x6b4   : > { %v2763_v19 = vpop.eup %2762  ;;  %v2003_v17 = vpack.c.bf16 %v2761_v57, %v2757_v50  ;;  %v3953_v57 = vmov 0  }
 0x6b5   : > { %v2004_v51 = vpack.c.bf16 %v2763_v19, %v2759_v59  ;;  %v2616_v59 = vld [vmem:[%s3881_s6] sm:$0xff]   ;;  %v2619_v19 = vld [vmem:[%s3881_s6 + $0x18] sm:$0xff]  }
 0x6b7   : > { %2035 = vmatprep.subr.bf16.mxu1 %v2004_v51 }
 0x6b8   : > { %2036 = vmatpush1.bf16.xpose.msra.mxu1 %v2003_v17  ;;  %v2139_v17 = vpop.permute.xlu1 %2138 }
 0x6bf   : > { %2038 = vmatmul.mubr.bf16.vlgmr.msra.gmra.mrb[52].mxu1 %v1258_v40 }
 0x6c0   : > { %2047 = vmatprep.mubr.bf16.mxu1 %v1261_v38 }
 0x6c7   : > { %2048 = vmatmul.mubr.bf16.gmra.mrb[56].mxu1 %v1260_v4 }
 0x6c8   : > { %2057 = vmatprep.mubr.bf16.mxu1 %v1263_v11 }
 0x6cf   : > { %2058 = vmatmul.mubr.bf16.gmra.mrb[60].mxu1 %v1262_v42 }
 0x6d0   : > { %2067 = vmatprep.mubr.bf16.mxu1 %v1265_v3  ;;  %v2618_v3 = vld [vmem:[%s3881_s6 + $0x10] sm:$0xff]  }
 0x6d7   : > { %2068 = vmatmul.mubr.bf16.gmra.mrb[64].mxu1 %v1264_v31  ;;  %v2617_v31 = vld [vmem:[%s3881_s6 + $0x8] sm:$0xff]  }
 0x6d8   : > { %2077 = vmatprep.mubr.bf16.mxu1 %v1267_v16  ;;  %v2144_v16 = vpop.permute.xlu0 %2143 }
 0x6df   : > { %2078 = vmatmul.mubr.bf16.gmra.mrb[68].mxu1 %v1266_v23  ;;  %v2768_v23 = vld [vmem:[%s2954_s21] sm:$0xff] }
 0x792   : > { %v2039_v62 = vpop.f32.mrb[52].mxu1 }
 0x793   : > { %v2041_v15 = vpop.f32.mrb[53].mxu1 }
 0x794   : > { %v2043_v56 = vpop.f32.mrb[54].mxu1 }
 0x795   : > { %v2045_v8 = vpop.f32.mrb[55].mxu1 }
 0x79a   : > { %v2049_v40 = vpop.f32.mrb[56].mxu1 }
 0x79b   : > { %v2051_v41 = vpop.f32.mrb[57].mxu1 }
 0x79c   : > { %v2053_v7 = vpop.f32.mrb[58].mxu1 }
 0x79d   : > { %v2055_v61 = vpop.f32.mrb[59].mxu1 }
 0x7a2   : > { %v2059_v36 = vpop.f32.mrb[60].mxu1 }
 0x7a3   : > { %v2061_v37 = vpop.f32.mrb[61].mxu1 }
 0x7a4   : > { %v2063_v55 = vpop.f32.mrb[62].mxu1 }
 0x7a5   : > { %v2065_v53 = vpop.f32.mrb[63].mxu1 }
 0x7aa   : > { %v2069_v26 = vpop.f32.mrb[64].mxu1 }
 0x7ab   : > { %v2071_v48 = vpop.f32.mrb[65].mxu1 }
 0x7ac   : > { %v2073_v29 = vpop.f32.mrb[66].mxu1 }
 0x7ad   : > { %v2075_v39 = vpop.f32.mrb[67].mxu1 }
 0x7b2   : > { %v2079_v33 = vpop.f32.mrb[68].mxu1 }
 0x7b3   : > { %2764 = vrcp.f32 %v2079_v33  ;;  %v2081_v47 = vpop.f32.mrb[69].mxu1 }
 0x7b4   : > { %2766 = vrcp.f32 %v2081_v47  ;;  %v2083_v27 = vpop.f32.mrb[70].mxu1 }
 0x7b5   : > { %v2084_v24 = vpop.f32.mrb[71].mxu1 }
 0x7bd   : > { %v2765_v14 = vpop.eup %2764 }
 0x7be   : > { %v2767_v0 = vpop.eup %2766  ;;  %v2091_v28 = vrot.slane %v2765_v14, %v2090_v46 }
 0x7bf   : > { %v2095_v22 = vrot.slane %v2767_v0, %v2090_v46  ;;  %v2774_v0 = vld [vmem:[%s2954_s21 + $0x30] sm:$0xff] }
 0x7c0   : > { %v2096_v58 = vmul.f32 %v2091_v28, %v2039_v62  ;;  %v2098_v25 = vmul.f32 %v2091_v28, %v2043_v56  ;;  %v2100_v10 = vmul.f32 %v2091_v28, %v2049_v40  ;;  %v2102_v4 = vmul.f32 %v2091_v28, %v2053_v7  ;;  %v2770_v7 = vld [vmem:[%s2954_s21 + $0x10] sm:$0xff] }
 0x7c1   : > { %v2097_v38 = vmul.f32 %v2095_v22, %v2041_v15  ;;  %v2099_v32 = vmul.f32 %v2095_v22, %v2045_v8  ;;  %v2101_v54 = vmul.f32 %v2095_v22, %v2051_v41  ;;  %v2103_v30 = vmul.f32 %v2095_v22, %v2055_v61  ;;  %v2769_v8 = vld [vmem:[%s2954_s21 + $0x8] sm:$0xff] }
 0x7c2   : > { %v2112_v35 = vpack.c.bf16 %v2098_v25, %v2096_v58  ;;  %v2114_v1 = vpack.c.bf16 %v2102_v4, %v2100_v10  ;;  %v2105_v63 = vmul.f32 %v2095_v22, %v2061_v37  ;;  %v2107_v34 = vmul.f32 %v2095_v22, %v2065_v53 }
 0x7c3   : > { %v2113_v42 = vpack.c.bf16 %v2099_v32, %v2097_v38  ;;  %v2115_v11 = vpack.c.bf16 %v2103_v30, %v2101_v54  ;;  %v2104_v52 = vmul.f32 %v2091_v28, %v2059_v36  ;;  %v2106_v50 = vmul.f32 %v2091_v28, %v2063_v55  ;;  %v2771_v36 = vld [vmem:[%s2954_s21 + $0x18] sm:$0xff]  ;;  %v2149_v55 = vpop.permute.xlu1 %2148 }
 0x7c4   : > { %v2117_v45 = vpack.c.bf16 %v2107_v34, %v2105_v63  ;;  %v2109_v49 = vmul.f32 %v2095_v22, %v2071_v48  ;;  %v2111_v12 = vmul.f32 %v2095_v22, %v2075_v39  ;;  %v2108_v13 = vmul.f32 %v2091_v28, %v2069_v26  ;;  %v2775_v22 = vld [vmem:[%s2954_s21 + $0x38] sm:$0xff] }
 0x7c5   : > { %2208 = vmatprep.subr.bf16.mxu0 %v2113_v42  ;;  %v2116_v43 = vpack.c.bf16 %v2106_v50, %v2104_v52  ;;  %v2110_v21 = vmul.f32 %v2091_v28, %v2073_v29  ;;  %v2154_v29 = vpop.permute.xlu0 %2153  ;;  %v2777_v42 = vld [vmem:[%s2954_s21 + $0x48] sm:$0xff]  ;;  %v2778_v50 = vld [vmem:[%s2954_s21 + $0x50] sm:$0xff] }
 0x7c6   : > { %2209 = vmatpush1.bf16.msra.mxu0 %v2112_v35  ;;  %v2119_v2 = vpack.c.bf16 %v2111_v12, %v2109_v49  ;;  %v2776_v35 = vld [vmem:[%s2954_s21 + $0x40] sm:$0xff]  ;;  %v2779_v49 = vld [vmem:[%s2954_s21 + $0x58] sm:$0xff] }
 0x7c7   : > { %2210 = vmatprep.subr.bf16.mxu0 %v2115_v11  ;;  %v2118_v9 = vpack.c.bf16 %v2110_v21, %v2108_v13  ;;  %v2159_v25 = vpop.permute.xlu1 %2158 }
 0x7c9   : > { %v2164_v32 = vpop.permute.xlu0 %2163 }
 0x7ca   : > { %2211 = vmatpush1.bf16.msra.mxu0 %v2114_v1 }
 0x7cb   : > { %2212 = vmatprep.subr.bf16.mxu0 %v2117_v45  ;;  %v2169_v13 = vpop.permute.xlu1 %2168 }
 0x7ce   : > { %2213 = vmatpush1.bf16.msra.mxu0 %v2116_v43 }
 0x7cf   : > { %2214 = vmatprep.subr.bf16.mxu0 %v2119_v2 }
 0x7d2   : > { %2215 = vmatpush1.bf16.msra.mxu0 %v2118_v9  ;;  %v2174_v9 = vpop.permute.xlu0 %2173 }
 0x7d5   : > { %2466 = vmatmul.mubr.msk.bf16.vlgmr.msra.gmra.mrb[72].mxu0 %vm410_vm0, %v2616_v59 }
 0x7d6   : > { %2250 = vmatprep.mubr.bf16.mxu0 %v3953_v57 }
 0x7dd   : > { %2467 = vmatmul.mubr.msk.bf16.gmra.mrb[76].mxu0 %vm410_vm0, %v2617_v31  ;;  %v2780_v31 = vld [vmem:[%s2954_s21 + $0x60] sm:$0xff] }
 0x7de   : > { %2260 = vmatprep.mubr.bf16.mxu0 %v3953_v57 }
 0x7e5   : > { %2468 = vmatmul.mubr.msk.bf16.gmra.mrb[80].mxu0 %vm410_vm0, %v2618_v3 }
 0x7e6   : > { %2270 = vmatprep.mubr.bf16.mxu0 %v3953_v57 }
 0x7ed   : > { %2469 = vmatmul.mubr.msk.bf16.gmra.mrb[84].mxu0 %vm410_vm0, %v2619_v19 }
 0x8a8   : > { %v2242_v51 = vpop.f32.mrb[72].mxu0 }
 0x8a9   : > { %v2243_v18 = vadd.f32 %v2242_v51, %v2139_v17  ;;  %v2244_v5 = vpop.f32.mrb[73].mxu0  ;;  %v2781_v51 = vld [vmem:[%s2954_s21 + $0x68] sm:$0xff] }
 0x8aa   : > { %v2245_v6 = vadd.f32 %v2244_v5, %v2139_v17  ;;  %v2246_v60 = vpop.f32.mrb[74].mxu0 }
 0x8ab   : > { %v2281_v62 = vadd.f32 %v2768_v23, %v2243_v18  ;;  %v2247_v15 = vadd.f32 %v2246_v60, %v2144_v16  ;;  %v2248_v56 = vpop.f32.mrb[75].mxu0  ;;  %v2783_v60 = vld [vmem:[%s2954_s21 + $0x78] sm:$0xff] }
 0x8ac   : > { %v2282_v40 = vadd.f32 %v2769_v8, %v2245_v6  ;;  %v2249_v41 = vadd.f32 %v2248_v56, %v2144_v16  ;;  %v2782_v16 = vld [vmem:[%s2954_s21 + $0x70] sm:$0xff] }
 0x8ad   : > { %2297 = vst [vmem:[%s3791_s18] sm:$0xff] %v2281_v62  ;;  %v2283_v61 = vadd.f32 %v2770_v7, %v2247_v15 }
 0x8ae   : > { %2298 = vst [vmem:[%s3791_s18 + $0x8] sm:$0xff] %v2282_v40  ;;  %v2284_v37 = vadd.f32 %v2771_v36, %v2249_v41 }
 0x8af   : > { %2299 = vst [vmem:[%s3791_s18 + $0x10] sm:$0xff] %v2283_v61 }
 0x8b0   : > { %2300 = vst [vmem:[%s3791_s18 + $0x18] sm:$0xff] %v2284_v37  ;;  %v2252_v53 = vpop.f32.mrb[76].mxu0 }
 0x8b1   : > { %v2253_v26 = vadd.f32 %v2252_v53, %v2149_v55  ;;  %v2254_v48 = vpop.f32.mrb[77].mxu0 }
 0x8b2   : > { %v2255_v39 = vadd.f32 %v2254_v48, %v2149_v55  ;;  %v2256_v33 = vpop.f32.mrb[78].mxu0 }
 0x8b3   : > { %v2285_v47 = vadd.f32 %v2772_v20, %v2253_v26  ;;  %v2257_v27 = vadd.f32 %v2256_v33, %v2154_v29  ;;  %v2258_v24 = vpop.f32.mrb[79].mxu0 }
 0x8b4   : > { %v2286_v46 = vadd.f32 %v2773_v44, %v2255_v39  ;;  %v2259_v14 = vadd.f32 %v2258_v24, %v2154_v29 }
 0x8b5   : > { %2301 = vst [vmem:[%s3791_s18 + $0x20] sm:$0xff] %v2285_v47  ;;  %v2287_v28 = vadd.f32 %v2774_v0, %v2257_v27 }
 0x8b6   : > { %2302 = vst [vmem:[%s3791_s18 + $0x28] sm:$0xff] %v2286_v46  ;;  %v2288_v58 = vadd.f32 %v2775_v22, %v2259_v14 }
 0x8b7   : > { %2303 = vst [vmem:[%s3791_s18 + $0x30] sm:$0xff] %v2287_v28 }
 0x8b8   : > { %2304 = vst [vmem:[%s3791_s18 + $0x38] sm:$0xff] %v2288_v58  ;;  %v2262_v10 = vpop.f32.mrb[80].mxu0 }
 0x8b9   : > { %v2263_v4 = vadd.f32 %v2262_v10, %v2159_v25  ;;  %v2264_v38 = vpop.f32.mrb[81].mxu0 }
 0x8ba   : > { %v2265_v54 = vadd.f32 %v2264_v38, %v2159_v25  ;;  %v2266_v30 = vpop.f32.mrb[82].mxu0 }
 0x8bb   : > { %v2289_v1 = vadd.f32 %v2776_v35, %v2263_v4  ;;  %v2267_v63 = vadd.f32 %v2266_v30, %v2164_v32  ;;  %v2268_v34 = vpop.f32.mrb[83].mxu0 }
 0x8bc   : > { %v2290_v11 = vadd.f32 %v2777_v42, %v2265_v54  ;;  %v2269_v52 = vadd.f32 %v2268_v34, %v2164_v32 }
 0x8bd   : > { %2305 = vst [vmem:[%s3791_s18 + $0x40] sm:$0xff] %v2289_v1  ;;  %v2291_v45 = vadd.f32 %v2778_v50, %v2267_v63 }
 0x8be   : > { %2306 = vst [vmem:[%s3791_s18 + $0x48] sm:$0xff] %v2290_v11  ;;  %v2292_v12 = vadd.f32 %v2779_v49, %v2269_v52 }
 0x8bf   : > { %2307 = vst [vmem:[%s3791_s18 + $0x50] sm:$0xff] %v2291_v45 }
 0x8c0   : > { %2308 = vst [vmem:[%s3791_s18 + $0x58] sm:$0xff] %v2292_v12  ;;  %v2272_v43 = vpop.f32.mrb[84].mxu0 }
 0x8c1   : > { %v2273_v21 = vadd.f32 %v2272_v43, %v2169_v13  ;;  %v2274_v2 = vpop.f32.mrb[85].mxu0 }
 0x8c2   : > { %v2275_v59 = vadd.f32 %v2274_v2, %v2169_v13  ;;  %v2276_v57 = vpop.f32.mrb[86].mxu0 }
 0x8c3   : > { %v2293_v3 = vadd.f32 %v2780_v31, %v2273_v21  ;;  %v2277_v19 = vadd.f32 %v2276_v57, %v2174_v9  ;;  %v2278_v17 = vpop.f32.mrb[87].mxu0 }
 0x8c4   : > { %v2294_v18 = vadd.f32 %v2781_v51, %v2275_v59  ;;  %v2279_v5 = vadd.f32 %v2278_v17, %v2174_v9 }
 0x8c5   : > { %2309 = vst [vmem:[%s3791_s18 + $0x60] sm:$0xff] %v2293_v3  ;;  %v2295_v6 = vadd.f32 %v2782_v16, %v2277_v19 }
 0x8c6   : > { %2310 = vst [vmem:[%s3791_s18 + $0x68] sm:$0xff] %v2294_v18  ;;  %v2296_v23 = vadd.f32 %v2783_v60, %v2279_v5 }
 0x8c7   : > { %2311 = vst [vmem:[%s3791_s18 + $0x70] sm:$0xff] %v2295_v6 }
 0x8c8   : > { %2312 = vst [vmem:[%s3791_s18 + $0x78] sm:$0xff] %v2296_v23 }
 0x8c9   : > { %2797 = shalt.err (!%p2794_p3)
}
 0x8ca   : > { %s2798_s21 = scalar_lea.hbm %s3824_s23, 2048  ;;  %s2802_s18 = scalar_lea.hbm %s3883_s8, 4096 }
 0x8cb   : > { %p2799_p4 = scmp.ne.s32.totalorder %s3824_s23, %s2798_s21  ;;  %p2803_p9 = scmp.lt.u32.totalorder %s3824_s23, %s3883_s8 }
 0x8cc   : > { %p2804_p10 = scmp.lt.u32.totalorder %s2802_s18, %s2798_s21  ;;  %p2806_p12 = scmp.lt.u32.totalorder %s2798_s21, %s3824_s23 }
 0x8cd   : > { %p2800_p7 = pnand %p2799_p4, %p2939_p5 }
 0x8ce   : > { %p2805_p11 = por %p2804_p10, %p2803_p9 }
 0x8cf   : > { %p2801_p8 = pneg %p2800_p7 }
 0x8d0   : > { %p2807_p13 = por %p2806_p12, %p2805_p11 }
 0x8d2   : > { %p2808_p0 = pnand %p2807_p13, %p2801_p8 }
 0x8d4   : > { %2811 = shalt.err (!%p2808_p0)
}
 0x8d5   : > { %s2854_s22 = smov 256   ;;  %s2855_s24 = smov 16  }
 0x8d6   : > { %2553 = dma.vmem_to_hbm [thread:$0]  (%p2939_p5), %s3826_s19, 2048, %s3824_s23, %s3834_s9, %s2854_s22, %s2854_s22, %s2855_s24  }
 0x8d7 PF: > { %p2559_p1 = scmp.ge.s32.totalorder %s2846_s30, 2  ;;  %s2342_s25 = sand.u32 1, %s2834_s27  }
 0x8d8   : > { %s2343_s10 = scalar_lea.sflag [#allocation3], %s2342_s25 }
 0x8d9   : > { %p2556_p2 = pnand %p2559_p1, %p2943_p6 }
 0x8db   : > { %2829 = dma.done.wait (!%p2556_p2), %s2343_s10, 2048  }
 0x8dc   : > { %2831 = vsyncadd (!%p2556_p2), %s2343_s10, 4294965248  ;;  %p18_p3 = scmp.ge.s32.totalorder %s2926_s11, 4   ;;  %s3954_s27 = smov %s2838_s28 }
 0x8dd   : > { %s3955_s28 = smov %s2842_s29  ;;  %s3956_s29 = smov %s2937_s14 }
 0x8de   : > { %s3957_s30 = smov %s2926_s11  ;;  %20 = sbr.rel (!%p18_p3) target bundleno = 3 (0x3), region = 87 }
 0x8e5   :  { %2348 = vsyncpa [#allocation3], 1 }
 0x8e6   :  { %2350 = vsyncpa [#allocation3 + $0x1], 1 }

</bundles_post_ra>
